<compile_context>
chip_gen: v7x
topology: tpu7x:2x2x1
jax: 0.10.0
libtpu: 0.0.40
codegen_flags: <defaults>
</compile_context>

<pallas_src>
import functools

import jax
import jax.numpy as jnp
import numpy as np
from jax import lax
from jax.experimental import pallas as pl
from jax.experimental.pallas import tpu as pltpu


def _round_up(x, m):
    return ((x + m - 1) // m) * m


def _cnn_kernel(ids_ref, ftab_ref, tapmask_ref, poolmask_ref, bconv_ref,
                wlin_ref, blin_ref, out_ref, *, out_channels, max_kh):
    bs = ids_ref.shape[0]                 # b_tile * seq_len rows in this tile
    v_pad = ftab_ref.shape[0]
    tc_pad = ftab_ref.shape[1]
    seq_len = poolmask_ref.shape[0]
    b_tile = out_ref.shape[0]
    c = out_channels

    # --- fused embedding gather + all-conv/all-tap projection (one matmul) --
    # One-hot rows are exactly 0/1 in bf16, so onehot @ fused_table (bf16 MXU,
    # f32 accumulate) reproduces the bf16-rounded fused_table rows exactly.
    ids = ids_ref[...]                                            # (bs, 1) i32
    iota_v = lax.broadcasted_iota(jnp.int32, (bs, v_pad), 1)
    onehot = (iota_v == ids).astype(jnp.bfloat16)                 # (bs, v_pad)
    y_all = jnp.dot(onehot, ftab_ref[...],
                    preferred_element_type=jnp.float32)           # (bs, tc_pad)

    # acc[b*S + t, off_i + ch] = sum_dh y_all[b*S + t + dh, off_i + dh*C + ch]
    # Time shift -> sublane roll of the flattened tensor; tap -> output-lane
    # alignment -> lane roll by dh*C.  Cross-batch bleed / wrap-around rows are
    # exactly the rows poolmask masks out.
    acc = y_all * tapmask_ref[0:1, :]
    for dh in range(1, max_kh):                                   # static unroll
        z = pltpu.roll(y_all, bs - dh, axis=0)                    # rows <- p+dh
        z = pltpu.roll(z, tc_pad - dh * c, axis=1)                # lanes <- l+dh*C
        acc = acc + z * tapmask_ref[dh:dh + 1, :]

    # Mask invalid time rows / non-output lanes (f32, -1e30), max-pool over
    # time, add bias, ReLU (ReLU after pool == pool after ReLU here).
    acc3 = acc.reshape(b_tile, seq_len, tc_pad) + poolmask_ref[...]
    pooled = jnp.max(acc3, axis=1) + bconv_ref[...]               # (b_tile, tc_pad)
    pooled = jnp.maximum(pooled, 0.0)

    # --- classifier head (lane-padded dense output; dropout = identity) -----
    logits = jnp.dot(pooled.astype(jnp.bfloat16), wlin_ref[...],
                     preferred_element_type=jnp.float32) + blin_ref[...]
    out_ref[...] = logits.astype(out_ref.dtype)


def cnn_forward(token_ids, embed_table, conv_ws, conv_bs, lin_w, lin_b,
                kernel_heights, *, b_tile=16):
    """token_ids: (B, S) int32; embed_table: (V, E) f32.

    conv_ws[i]: (kh_i, E, C); conv_bs[i]: (1, C)
    lin_w: (3C, output_size); lin_b: (1, output_size)
    Returns logits (B, output_size) float32.
    """
    token_ids = jnp.asarray(token_ids, jnp.int32)
    B, S = token_ids.shape
    V, E = embed_table.shape
    C = conv_ws[0].shape[2]
    khs = tuple(int(k) for k in kernel_heights)
    n_conv = len(khs)
    out_size = lin_w.shape[1]
    max_kh = max(khs)

    # Column layout of the fused projection: block (conv i, tap dh) occupies
    # lanes [off_i + dh*C, off_i + (dh+1)*C); conv i's pooled output lives in
    # lanes [off_i, off_i + C).
    offs, o = [], 0
    for kh in khs:
        offs.append(o)
        o += kh * C
    total_c = o
    tc_pad = _round_up(max(total_c, 128), 128)
    out_pad = _round_up(max(out_size, 128), 128)
    v_pad = _round_up(V, 16)                       # bf16 sublane packing

    # Fused conv weight (E, tc_pad), pre-contracted with the embedding table:
    # (onehot @ embed) @ W == onehot @ (embed @ W)  (associativity).
    wconv = np.zeros((E, tc_pad), np.float32)
    for i, (w, kh) in enumerate(zip(conv_ws, khs)):
        blk = np.transpose(np.asarray(w, np.float32), (1, 0, 2)).reshape(E, kh * C)
        wconv[:, offs[i]:offs[i] + kh * C] = blk
    ftab_f32 = jnp.asarray(embed_table, jnp.float32) @ jnp.asarray(wconv)
    ftab = jnp.zeros((v_pad, tc_pad), jnp.bfloat16).at[:V, :].set(
        ftab_f32.astype(jnp.bfloat16))

    # Static masks (value-independent).  Keep all masking math in f32.
    NEG = np.float32(-1e30)
    tap_rows = _round_up(max_kh, 8)
    tapmask = np.zeros((tap_rows, tc_pad), np.float32)
    poolmask = np.full((S, tc_pad), NEG, np.float32)
    for i, kh in enumerate(khs):
        for dh in range(kh):
            tapmask[dh, offs[i]:offs[i] + C] = 1.0
        poolmask[: S - kh + 1, offs[i]:offs[i] + C] = 0.0

    # Conv bias / linear weight / linear bias spread to the fused-lane layout.
    bconv = np.zeros((1, tc_pad), np.float32)
    wlin = np.zeros((tc_pad, out_pad), np.float32)
    for i in range(n_conv):
        bconv[0, offs[i]:offs[i] + C] = np.asarray(conv_bs[i], np.float32).reshape(-1)
        wlin[offs[i]:offs[i] + C, :out_size] = np.asarray(
            lin_w, np.float32)[i * C:(i + 1) * C, :]
    blin = np.zeros((1, out_pad), np.float32)
    blin[0, :out_size] = np.asarray(lin_b, np.float32).reshape(-1)

    # Batch tiling: pad B so the grid has >= 2 (and even) steps -> software
    # pipelining + both v7x TensorCores engaged even for tiny batches.
    n_tiles = max(2, pl.cdiv(B, b_tile))
    if n_tiles % 2:
        n_tiles += 1
    B_pad = n_tiles * b_tile
    bs = b_tile * S
    ids = jnp.zeros((B_pad, S), jnp.int32).at[:B, :].set(token_ids)
    # TODO(synk): ids travel as a (bs, 1) sublane-major VMEM block; for long
    # sequences move them to SMEM via PrefetchScalarGridSpec instead.
    ids_flat = ids.reshape(B_pad * S, 1)

    # Explicit VMEM budget derived from the footprint (generous margin,
    # floored at the v5e default scoped limit, capped well under v7x physical).
    est = (2 * bs * 128 * 4                        # ids block (lane padded) x2
           + ftab.size * 2 + wlin.size * 2         # single-buffered bf16 weights
           + (tapmask.size + poolmask.size + bconv.size + blin.size) * 4
           + 2 * b_tile * out_pad * 4              # output block x2
           + 8 * bs * tc_pad * 4)                  # in-kernel f32 intermediates
    vmem_limit = int(min(48 << 20, max(16 << 20, 2 * est)))

    kernel = functools.partial(_cnn_kernel, out_channels=C, max_kh=max_kh)

    def const_spec(shape):
        # Constant-index blocks: fetched once, single-buffered (no 2x VMEM).
        return pl.BlockSpec(shape, lambda i: (0, 0), pipeline_mode=pl.Buffered(1))

    out_padded = pl.pallas_call(
        kernel,
        out_shape=jax.ShapeDtypeStruct((B_pad, out_pad), jnp.float32),
        grid=(n_tiles,),
        in_specs=[
            pl.BlockSpec((bs, 1), lambda i: (i, 0)),         # token ids
            const_spec((v_pad, tc_pad)),                     # fused embed @ Wconv
            const_spec((tap_rows, tc_pad)),                  # tap mask
            const_spec((S, tc_pad)),                         # pool / time mask
            const_spec((1, tc_pad)),                         # conv bias
            const_spec((tc_pad, out_pad)),                   # linear W (spread)
            const_spec((1, out_pad)),                        # linear bias
        ],
        out_specs=pl.BlockSpec((b_tile, out_pad), lambda i: (i, 0)),
        compiler_params=pltpu.CompilerParams(
            dimension_semantics=("parallel",),
            vmem_limit_bytes=vmem_limit),
    )(ids_flat, ftab, jnp.asarray(tapmask), jnp.asarray(poolmask),
      jnp.asarray(bconv), jnp.asarray(wlin).astype(jnp.bfloat16),
      jnp.asarray(blin))

    return out_padded[:B, :out_size]


def _reference(token_ids, embed_table, conv_ws, conv_bs, lin_w, lin_b,
               kernel_heights):
    """Pure-JAX f32 reference matching the PyTorch forward semantics."""
    emb = jnp.take(embed_table, token_ids, axis=0).astype(jnp.float32)
    B, S, E = emb.shape
    feats = []
    for (w, b, kh) in zip(conv_ws, conv_bs, kernel_heights):
        S_out = S - kh + 1
        conv = jnp.zeros((B, S_out, w.shape[2]), jnp.float32)
        for dh in range(kh):
            conv = conv + jnp.einsum('bse,ec->bsc', emb[:, dh:dh + S_out, :], w[dh])
        conv = conv + b[None, :, :]
        conv = jnp.maximum(conv, 0.0)
        feats.append(jnp.max(conv, axis=1))
    all_out = jnp.concatenate(feats, axis=1)
    return all_out @ lin_w + lin_b


if __name__ == "__main__":
    # Small, module-consistent shapes.
    batch_size = 2
    seq_len = 16
    vocab_size = 50
    embedding_length = 128
    in_channels = 1
    out_channels = 8
    kernel_heights = (3, 4, 5)
    output_size = 2

    key = jax.random.PRNGKey(0)
    keys = jax.random.split(key, 10)

    token_ids = jax.random.randint(keys[0], (batch_size, seq_len), 0, vocab_size,
                                   dtype=jnp.int32)
    embed_table = jax.random.normal(keys[1], (vocab_size, embedding_length),
                                    dtype=jnp.float32) * 0.1

    conv_ws = []
    conv_bs = []
    for i, kh in enumerate(kernel_heights):
        # PyTorch Conv2d weight (C, 1, kh, E) -> our layout (kh, E, C).
        w_pt = jax.random.normal(keys[2 + i],
                                 (out_channels, in_channels, kh, embedding_length),
                                 dtype=jnp.float32) * 0.05
        conv_ws.append(jnp.transpose(w_pt[:, 0, :, :], (1, 2, 0)))   # (kh, E, C)
        conv_bs.append(
            (jax.random.normal(keys[5 + i], (out_channels,), dtype=jnp.float32)
             * 0.05).reshape(1, out_channels))

    # PyTorch Linear weight (output_size, 3C) -> our layout (3C, output_size).
    lin_w_pt = jax.random.normal(
        keys[8], (output_size, len(kernel_heights) * out_channels),
        dtype=jnp.float32) * 0.05
    lin_w = jnp.transpose(lin_w_pt, (1, 0))
    lin_b = (jax.random.normal(keys[9], (output_size,), dtype=jnp.float32)
             * 0.05).reshape(1, output_size)

    logits = cnn_forward(token_ids, embed_table, conv_ws, conv_bs, lin_w, lin_b,
                         kernel_heights)
    logits = jax.block_until_ready(logits)

    ref = _reference(token_ids, embed_table, conv_ws, conv_bs, lin_w, lin_b,
                     kernel_heights)
    assert logits.shape == (batch_size, output_size)
    # bf16 MXU operands (fused table / pooled / head weights) -> bf16-level
    # tolerance against the f32 reference.
    np.testing.assert_allclose(np.asarray(logits), np.asarray(ref),
                               rtol=2e-2, atol=5e-3)
    print("KERNEL_OK")
</pallas_src>

<mosaic_0001>
module attributes {stable_mosaic.version = 11 : i64} {
  func.func @_cnn_kernel(%arg0: i32, %arg1: memref<256x1xi32, #tpu.memory_space<vmem>>, %arg2: memref<64x128xbf16, #tpu.memory_space<vmem>>, %arg3: memref<8x128xf32, #tpu.memory_space<vmem>>, %arg4: memref<16x128xf32, #tpu.memory_space<vmem>>, %arg5: memref<1x128xf32, #tpu.memory_space<vmem>>, %arg6: memref<128x128xbf16, #tpu.memory_space<vmem>>, %arg7: memref<1x128xf32, #tpu.memory_space<vmem>>, %arg8: memref<16x128xf32, #tpu.memory_space<vmem>>) attributes {dimension_semantics = [#tpu.dimension_semantics<parallel>], iteration_bounds = array<i64: 2>, scalar_prefetch = 0 : i64, scratch_operands = 0 : i64, tpu.core_type = #tpu.core_type<tc>, window_params = [{transform_indices = @transform_0, window_bounds = array<i64: 256, 1>}, {pipeline_mode = #tpu.pipeline_mode<synchronous>, transform_indices = @transform_1, window_bounds = array<i64: 64, 128>}, {pipeline_mode = #tpu.pipeline_mode<synchronous>, transform_indices = @transform_2, window_bounds = array<i64: 8, 128>}, {pipeline_mode = #tpu.pipeline_mode<synchronous>, transform_indices = @transform_3, window_bounds = array<i64: 16, 128>}, {pipeline_mode = #tpu.pipeline_mode<synchronous>, transform_indices = @transform_4, window_bounds = array<i64: 1, 128>}, {pipeline_mode = #tpu.pipeline_mode<synchronous>, transform_indices = @transform_5, window_bounds = array<i64: 128, 128>}, {pipeline_mode = #tpu.pipeline_mode<synchronous>, transform_indices = @transform_6, window_bounds = array<i64: 1, 128>}, {transform_indices = @transform_7, window_bounds = array<i64: 16, 128>}]} {
    %c0 = arith.constant 0 : index
    %c0_0 = arith.constant 0 : index
    %0 = vector.load %arg1[%c0, %c0_0] : memref<256x1xi32, #tpu.memory_space<vmem>>, vector<256x1xi32>
    %1 = tpu.iota {dimensions = array<i32: 1>} : vector<256x64xi32>
    %2 = vector.broadcast %0 : vector<256x1xi32> to vector<256x64xi32>
    %3 = arith.cmpi eq, %1, %2 : vector<256x64xi32>
    %4 = arith.extui %3 : vector<256x64xi1> to vector<256x64xi32>
    %5 = arith.sitofp %4 : vector<256x64xi32> to vector<256x64xf32>
    %6 = arith.truncf %5 : vector<256x64xf32> to vector<256x64xbf16>
    %c0_1 = arith.constant 0 : index
    %c0_2 = arith.constant 0 : index
    %7 = vector.load %arg2[%c0_1, %c0_2] : memref<64x128xbf16, #tpu.memory_space<vmem>>, vector<64x128xbf16>
    %cst = arith.constant dense<0.000000e+00> : vector<256x128xf32>
    %8 = tpu.matmul %6, %7, %cst {dimension_numbers = #tpu.dot_dimension_numbers<[1], [0], [0], [1], [0, 0, 1, 1], [], []>} : vector<256x64xbf16>, vector<64x128xbf16>, vector<256x128xf32> -> vector<256x128xf32>
    %c0_3 = arith.constant 0 : index
    %c0_4 = arith.constant 0 : index
    %9 = vector.load %arg3[%c0_3, %c0_4] : memref<8x128xf32, #tpu.memory_space<vmem>>, vector<1x128xf32>
    %10 = vector.broadcast %9 : vector<1x128xf32> to vector<256x128xf32>
    %11 = arith.mulf %8, %10 : vector<256x128xf32>
    %c255_i32 = arith.constant 255 : i32
    %12 = tpu.dynamic_rotate %8 by %c255_i32 dim 0 : vector<256x128xf32>, i32 -> vector<256x128xf32>
    %c120_i32 = arith.constant 120 : i32
    %13 = tpu.dynamic_rotate %12 by %c120_i32 dim 1 : vector<256x128xf32>, i32 -> vector<256x128xf32>
    %c1 = arith.constant 1 : index
    %c0_5 = arith.constant 0 : index
    %14 = vector.load %arg3[%c1, %c0_5] : memref<8x128xf32, #tpu.memory_space<vmem>>, vector<1x128xf32>
    %15 = vector.broadcast %14 : vector<1x128xf32> to vector<256x128xf32>
    %16 = arith.mulf %13, %15 : vector<256x128xf32>
    %17 = arith.addf %11, %16 : vector<256x128xf32>
    %c254_i32 = arith.constant 254 : i32
    %18 = tpu.dynamic_rotate %8 by %c254_i32 dim 0 : vector<256x128xf32>, i32 -> vector<256x128xf32>
    %c112_i32 = arith.constant 112 : i32
    %19 = tpu.dynamic_rotate %18 by %c112_i32 dim 1 : vector<256x128xf32>, i32 -> vector<256x128xf32>
    %c2 = arith.constant 2 : index
    %c0_6 = arith.constant 0 : index
    %20 = vector.load %arg3[%c2, %c0_6] : memref<8x128xf32, #tpu.memory_space<vmem>>, vector<1x128xf32>
    %21 = vector.broadcast %20 : vector<1x128xf32> to vector<256x128xf32>
    %22 = arith.mulf %19, %21 : vector<256x128xf32>
    %23 = arith.addf %17, %22 : vector<256x128xf32>
    %c253_i32 = arith.constant 253 : i32
    %24 = tpu.dynamic_rotate %8 by %c253_i32 dim 0 : vector<256x128xf32>, i32 -> vector<256x128xf32>
    %c104_i32 = arith.constant 104 : i32
    %25 = tpu.dynamic_rotate %24 by %c104_i32 dim 1 : vector<256x128xf32>, i32 -> vector<256x128xf32>
    %c3 = arith.constant 3 : index
    %c0_7 = arith.constant 0 : index
    %26 = vector.load %arg3[%c3, %c0_7] : memref<8x128xf32, #tpu.memory_space<vmem>>, vector<1x128xf32>
    %27 = vector.broadcast %26 : vector<1x128xf32> to vector<256x128xf32>
    %28 = arith.mulf %25, %27 : vector<256x128xf32>
    %29 = arith.addf %23, %28 : vector<256x128xf32>
    %c252_i32 = arith.constant 252 : i32
    %30 = tpu.dynamic_rotate %8 by %c252_i32 dim 0 : vector<256x128xf32>, i32 -> vector<256x128xf32>
    %c96_i32 = arith.constant 96 : i32
    %31 = tpu.dynamic_rotate %30 by %c96_i32 dim 1 : vector<256x128xf32>, i32 -> vector<256x128xf32>
    %c4 = arith.constant 4 : index
    %c0_8 = arith.constant 0 : index
    %32 = vector.load %arg3[%c4, %c0_8] : memref<8x128xf32, #tpu.memory_space<vmem>>, vector<1x128xf32>
    %33 = vector.broadcast %32 : vector<1x128xf32> to vector<256x128xf32>
    %34 = arith.mulf %31, %33 : vector<256x128xf32>
    %35 = arith.addf %29, %34 : vector<256x128xf32>
    %36 = vector.shape_cast %35 : vector<256x128xf32> to vector<16x16x128xf32>
    %c0_9 = arith.constant 0 : index
    %c0_10 = arith.constant 0 : index
    %37 = vector.load %arg4[%c0_9, %c0_10] : memref<16x128xf32, #tpu.memory_space<vmem>>, vector<16x128xf32>
    %38 = vector.shape_cast %37 : vector<16x128xf32> to vector<1x16x128xf32>
    %39 = vector.broadcast %38 : vector<1x16x128xf32> to vector<16x16x128xf32>
    %40 = arith.addf %36, %39 : vector<16x16x128xf32>
    %cst_11 = arith.constant dense<0xFF800000> : vector<16x128xf32>
    %41 = vector.multi_reduction <maximumf>, %40, %cst_11 [1] : vector<16x16x128xf32> to vector<16x128xf32>
    %c0_12 = arith.constant 0 : index
    %c0_13 = arith.constant 0 : index
    %42 = vector.load %arg5[%c0_12, %c0_13] : memref<1x128xf32, #tpu.memory_space<vmem>>, vector<1x128xf32>
    %43 = vector.broadcast %42 : vector<1x128xf32> to vector<16x128xf32>
    %44 = arith.addf %41, %43 : vector<16x128xf32>
    %cst_14 = arith.constant 0.000000e+00 : f32
    %45 = vector.broadcast %cst_14 : f32 to vector<16x128xf32>
    %46 = arith.maximumf %44, %45 : vector<16x128xf32>
    %47 = arith.truncf %46 : vector<16x128xf32> to vector<16x128xbf16>
    %c0_15 = arith.constant 0 : index
    %c0_16 = arith.constant 0 : index
    %48 = vector.load %arg6[%c0_15, %c0_16] : memref<128x128xbf16, #tpu.memory_space<vmem>>, vector<128x128xbf16>
    %cst_17 = arith.constant dense<0.000000e+00> : vector<16x128xf32>
    %49 = tpu.matmul %47, %48, %cst_17 {dimension_numbers = #tpu.dot_dimension_numbers<[1], [0], [0], [1], [0, 0, 1, 1], [], []>} : vector<16x128xbf16>, vector<128x128xbf16>, vector<16x128xf32> -> vector<16x128xf32>
    %c0_18 = arith.constant 0 : index
    %c0_19 = arith.constant 0 : index
    %50 = vector.load %arg7[%c0_18, %c0_19] : memref<1x128xf32, #tpu.memory_space<vmem>>, vector<1x128xf32>
    %51 = vector.broadcast %50 : vector<1x128xf32> to vector<16x128xf32>
    %52 = arith.addf %49, %51 : vector<16x128xf32>
    %c0_20 = arith.constant 0 : index
    %c0_21 = arith.constant 0 : index
    %53 = vector.load %arg8[%c0_20, %c0_21] : memref<16x128xf32, #tpu.memory_space<vmem>>, vector<16x128xf32>
    tpu.vector_store %arg8[%c0_20, %c0_21], %52 {strides = array<i32>} : memref<16x128xf32, #tpu.memory_space<vmem>>, vector<16x128xf32>,
    return
  }
  func.func @transform_0(%arg0: i32) -> (i32, i32) {
    %c0_i32 = arith.constant 0 : i32
    %c0_i32_0 = arith.constant 0 : i32
    return %arg0, %c0_i32 : i32, i32
  }
  func.func @transform_1(%arg0: i32) -> (i32, i32) {
    %c0_i32 = arith.constant 0 : i32
    %c0_i32_0 = arith.constant 0 : i32
    %c0_i32_1 = arith.constant 0 : i32
    return %c0_i32, %c0_i32_0 : i32, i32
  }
  func.func @transform_2(%arg0: i32) -> (i32, i32) {
    %c0_i32 = arith.constant 0 : i32
    %c0_i32_0 = arith.constant 0 : i32
    %c0_i32_1 = arith.constant 0 : i32
    return %c0_i32, %c0_i32_0 : i32, i32
  }
  func.func @transform_3(%arg0: i32) -> (i32, i32) {
    %c0_i32 = arith.constant 0 : i32
    %c0_i32_0 = arith.constant 0 : i32
    %c0_i32_1 = arith.constant 0 : i32
    return %c0_i32, %c0_i32_0 : i32, i32
  }
  func.func @transform_4(%arg0: i32) -> (i32, i32) {
    %c0_i32 = arith.constant 0 : i32
    %c0_i32_0 = arith.constant 0 : i32
    %c0_i32_1 = arith.constant 0 : i32
    return %c0_i32, %c0_i32_0 : i32, i32
  }
  func.func @transform_5(%arg0: i32) -> (i32, i32) {
    %c0_i32 = arith.constant 0 : i32
    %c0_i32_0 = arith.constant 0 : i32
    %c0_i32_1 = arith.constant 0 : i32
    return %c0_i32, %c0_i32_0 : i32, i32
  }
  func.func @transform_6(%arg0: i32) -> (i32, i32) {
    %c0_i32 = arith.constant 0 : i32
    %c0_i32_0 = arith.constant 0 : i32
    %c0_i32_1 = arith.constant 0 : i32
    return %c0_i32, %c0_i32_0 : i32, i32
  }
  func.func @transform_7(%arg0: i32) -> (i32, i32) {
    %c0_i32 = arith.constant 0 : i32
    %c0_i32_0 = arith.constant 0 : i32
    return %arg0, %c0_i32 : i32, i32
  }
}

</mosaic_0001>

<bundles_post_ra>
// kernel: tpu_custom_call.1
= control target key start
LH: loop header
LB: loop body
LE: loop exit
PB: predicated region body
PF: predicated region fallthrough
CT: control target
= control target key end

     0   :  { %12 = vsyncpa [#allocation3], 0  ;;  %s3987_s0 = inlined_call_operand.vmem [shape: s32[512,1], index: 0, kind: input, shape index: {}]   ;;  %s3988_s1 = inlined_call_operand.vmem [shape: bf16[64,128], index: 1, kind: input, shape index: {}]   ;;  %s3989_s2 = inlined_call_operand.vmem [shape: f32[8,128], index: 2, kind: input, shape index: {}]   ;;  %s3990_s3 = inlined_call_operand.vmem [shape: f32[16,128], index: 3, kind: input, shape index: {}]   ;;  %s3991_s4 = inlined_call_operand.vmem [shape: f32[1,128], index: 4, kind: input, shape index: {}]   ;;  %s3992_s5 = inlined_call_operand.vmem [shape: bf16[128,128], index: 5, kind: input, shape index: {}]   ;;  %s3993_s6 = inlined_call_operand.vmem [shape: f32[1,128], index: 6, kind: input, shape index: {}]   ;;  %s3994_s7 = inlined_call_operand.hbm [shape: f32[32,128], index: 7, kind: output, shape index: {}]  }
   0x1   :  { %14 = vsyncpa [#allocation3 + $0x1], 0  ;;  %s2409_s24 = smov 0   ;;  %s2411_s25 = smov 0  }
   0x2   :  { %s2413_s26 = smov 0   ;;  %s2415_s27 = smov 0  }
   0x3 LB: > { %s2430_s28 = sadd.s32 4294967295, %s2357_s27   ;;  %s2056_s29 = sadd.s32 4294967294, %s2357_s27   ;;  %s2357_s27 = sphi %s2415_s27, %s4186_s27   ;;  %s2353_s26 = sphi %s2413_s26, %s4185_s26   ;;  %s2349_s25 = sphi %s2411_s25, %s4184_s25   ;;  %s2345_s24 = sphi %s2409_s24, %s4183_s24  }
   0x4   : > { %s2434_s30 = sadd.s32 1, %s2357_s27   ;;  %s179_s8 = sadd.s32 1, %s2353_s26 }
   0x5   : > { %s176_s9 = ssub.s32 %s2357_s27, %s2434_s30  ;;  %p189_p0 = scmp.ne.s32.totalorder %s2353_s26, %s2349_s25 }
   0x6   : > { %p177_p1 = scmp.eq.s32.totalorder %s176_s9, 0  ;;  %p190_p2 = scmp.eq.s32.totalorder %s2430_s28, 1 }
   0x7   : > { %p195_p3 = scmp.ne.s32.totalorder %s2349_s25, %s2345_s24  ;;  %p196_p4 = scmp.eq.s32.totalorder %s2056_s29, 1 }
   0x8   : > { %s2445_s10 = scalar_select %p177_p1, %s2353_s26, %s179_s8  }
   0x9   : > { %p2447_p5 = por %p190_p2, %p189_p0  ;;  %p2451_p6 = por %p196_p4, %p195_p3 }
   0xa   : > { %p2059_p7 = scmp.ge.s32.totalorder %s2357_s27, 1  ;;  %p241_p8 = scmp.lt.s32.totalorder %s2357_s27, 3 }
   0xc   : > { %p242_p9 = pnand %p2059_p7, %p241_p8 }
   0xe   : > { %245 = sbr.rel (%p242_p9) target bundleno = 1014 (0x3f6), region = 48 }
  0x15   : > { %s2061_s13 = sshll.u32 %s2430_s28, 5  ;;  %v2359_v0 = vmov 0   ;;  %v2275_v1 = vld [vmem:[%s3988_s1] sm:$0xff]   ;;  %v2276_v2 = vld [vmem:[%s3988_s1 + $0x8] sm:$0xff]   ;;  %v3995_v3 = vmov 0.0   ;;  %v2277_v12 = vld [vmem:[%s3988_s1 + $0x10] sm:$0xff]   ;;  %v313_v38 = vlaneseq }
  0x16   : > { %2274 = vset.pattern.permute.xlu1 %v2359_v0  ;;  %2273 = vset.pattern.permute.xlu0 %v2359_v0  ;;  %p274_p10 = scmp.lt.s32.totalorder %s2061_s13, 63  ;;  %v2278_v13 = vld [vmem:[%s3988_s1 + $0x18] sm:$0xff]   ;;  %vm555_vm4 = vcmask 523264   ;;  %s2361_s9 = smov 120  }
  0x17   : > { %2165 = vmatprep.subr.bf16.mxu0 %v2275_v1  ;;  %2205 = vmatprep.subr.bf16.mxu1 %v3995_v3  ;;  %v2509_v39 = vand.u32 127, %v313_v38  ;;  %s2363_s14 = smov 104   ;;  %s2364_s15 = smov 96  }
  0x18   : > { %s4188_s13 = smov (!%p274_p10, %s2061_s13), 63  ;;  %2166 = vmatpush3.bf16.msra.mxu0 %v2275_v1  ;;  %s270_s22 = sand.u32 1, %s2349_s25  }
  0x19   : > { %s2062_s18 = sshll.u32 %s4188_s13, 3  ;;  %2167 = vmatprep.subr.bf16.mxu0 %v2276_v2  ;;  %s2362_s13 = smov 112  }
  0x1a   : > { %s2468_s21 = scalar_lea.vmem %s3987_s0, %s2062_s18  ;;  %s2060_s23 = sshll.u32 %s270_s22, 4 }
  0x1b   : > { %v283_v4 = vld [vmem:[%s2468_s21 + $0x10] sm:$0xff]  ;;  %v281_v5 = vld [vmem:[%s2468_s21] sm:$0xff]  ;;  %v284_v6 = vld [vmem:[%s2468_s21 + $0x18] sm:$0xff]  ;;  %s272_s16 = scalar_lea.vmem [#allocation2], %s2060_s23  ;;  %s2135_s18 = sshll.u32 %s2430_s28, 8 }
  0x1c   : > { %322 = vperm.xlu1 %2274, %v283_v4   ;;  %316 = vperm.xlu0 %2273, %v281_v5   ;;  %v282_v7 = vld [vmem:[%s2468_s21 + $0x8] sm:$0xff]  ;;  %v285_v9 = vld [vmem:[%s2468_s21 + $0x20] sm:$0xff]  ;;  %v288_v10 = vld [vmem:[%s2468_s21 + $0x38] sm:$0xff]  ;;  %s1994_s17 = sshll.u32 %s272_s16, 4  ;;  %s3939_s17 = int_to_ptr.vmem [resolvable:$true] %s1994_s17 }
  0x1d   : > { %2168 = vmatpush3.bf16.msra.mxu0 %v2276_v2  ;;  %v286_v8 = vld [vmem:[%s2468_s21 + $0x28] sm:$0xff]  ;;  %v287_v11 = vld [vmem:[%s2468_s21 + $0x30] sm:$0xff]  ;;  %v289_v15 = vld [vmem:[%s2468_s21 + $0x40] sm:$0xff]  ;;  %s2295_s28 = scalar_lea.vmem %s3939_s17, 256 }
  0x1e   : > { %2169 = vmatprep.subr.bf16.mxu0 %v2277_v12  ;;  %v290_v14 = vld [vmem:[%s2468_s21 + $0x48] sm:$0xff]  ;;  %v292_v16 = vld [vmem:[%s2468_s21 + $0x58] sm:$0xff]  ;;  %v291_v17 = vld [vmem:[%s2468_s21 + $0x50] sm:$0xff]  ;;  %p2296_p11 = scmp.ne.s32.totalorder %s3939_s17, %s2295_s28 }
  0x1f   : > { %v294_v18 = vld [vmem:[%s2468_s21 + $0x68] sm:$0xff]  ;;  %v293_v19 = vld [vmem:[%s2468_s21 + $0x60] sm:$0xff]  ;;  %v296_v20 = vld [vmem:[%s2468_s21 + $0x78] sm:$0xff] }
  0x20   : > { %325 = vperm.xlu1 %2274, %v284_v6   ;;  %319 = vperm.xlu0 %2273, %v282_v7   ;;  %v295_v21 = vld [vmem:[%s2468_s21 + $0x70] sm:$0xff]  ;;  %v298_v22 = vld [vmem:[%s2468_s21 + $0x88] sm:$0xff]  ;;  %v297_v23 = vld [vmem:[%s2468_s21 + $0x80] sm:$0xff]  ;;  %p2297_p12 = pnand %p2296_p11, %p2447_p5 }
  0x21   : > { %2170 = vmatpush3.bf16.msra.mxu0 %v2277_v12  ;;  %v300_v24 = vld [vmem:[%s2468_s21 + $0x98] sm:$0xff]  ;;  %v299_v25 = vld [vmem:[%s2468_s21 + $0x90] sm:$0xff]  ;;  %v302_v26 = vld [vmem:[%s2468_s21 + $0xa8] sm:$0xff] }
  0x22   : > { %2171 = vmatprep.subr.bf16.mxu0 %v2278_v13  ;;  %v301_v27 = vld [vmem:[%s2468_s21 + $0xa0] sm:$0xff]  ;;  %v304_v28 = vld [vmem:[%s2468_s21 + $0xb8] sm:$0xff]  ;;  %v303_v29 = vld [vmem:[%s2468_s21 + $0xb0] sm:$0xff]  ;;  %p2298_p13 = pneg %p2297_p12 }
  0x23   : > { %v306_v30 = vld [vmem:[%s2468_s21 + $0xc8] sm:$0xff]  ;;  %v305_v31 = vld [vmem:[%s2468_s21 + $0xc0] sm:$0xff]  ;;  %v308_v32 = vld [vmem:[%s2468_s21 + $0xd8] sm:$0xff] }
  0x24   : > { %331 = vperm.xlu1 %2274, %v286_v8   ;;  %328 = vperm.xlu0 %2273, %v285_v9   ;;  %v307_v33 = vld [vmem:[%s2468_s21 + $0xd0] sm:$0xff]  ;;  %v310_v34 = vld [vmem:[%s2468_s21 + $0xe8] sm:$0xff]  ;;  %v309_v35 = vld [vmem:[%s2468_s21 + $0xe0] sm:$0xff] }
  0x25   : > { %2172 = vmatpush3.bf16.msra.mxu0 %v2278_v13  ;;  %v312_v36 = vld [vmem:[%s2468_s21 + $0xf8] sm:$0xff]  ;;  %v311_v37 = vld [vmem:[%s2468_s21 + $0xf0] sm:$0xff]  ;;  %s3944_s21 = scalar_lea.hbm %s3994_s7, %s2135_s18 }
  0x28   : > { %337 = vperm.xlu1 %2274, %v288_v10   ;;  %334 = vperm.xlu0 %2273, %v287_v11  }
  0x2c   : > { %343 = vperm.xlu1 %2274, %v290_v14   ;;  %340 = vperm.xlu0 %2273, %v289_v15  }
  0x30   : > { %349 = vperm.xlu1 %2274, %v292_v16   ;;  %346 = vperm.xlu0 %2273, %v291_v17  }
  0x34   : > { %355 = vperm.xlu1 %2274, %v294_v18   ;;  %352 = vperm.xlu0 %2273, %v293_v19  }
  0x38   : > { %361 = vperm.xlu1 %2274, %v296_v20   ;;  %358 = vperm.xlu0 %2273, %v295_v21  }
  0x3c   : > { %367 = vperm.xlu1 %2274, %v298_v22   ;;  %364 = vperm.xlu0 %2273, %v297_v23  }
  0x40   : > { %373 = vperm.xlu1 %2274, %v300_v24   ;;  %370 = vperm.xlu0 %2273, %v299_v25  }
  0x44   : > { %379 = vperm.xlu1 %2274, %v302_v26   ;;  %376 = vperm.xlu0 %2273, %v301_v27  }
  0x48   : > { %385 = vperm.xlu1 %2274, %v304_v28   ;;  %382 = vperm.xlu0 %2273, %v303_v29  }
  0x4c   : > { %391 = vperm.xlu1 %2274, %v306_v30   ;;  %388 = vperm.xlu0 %2273, %v305_v31  }
  0x50   : > { %397 = vperm.xlu1 %2274, %v308_v32   ;;  %394 = vperm.xlu0 %2273, %v307_v33  }
  0x54   : > { %403 = vperm.xlu1 %2274, %v310_v34   ;;  %400 = vperm.xlu0 %2273, %v309_v35  }
  0x58   : > { %409 = vperm.xlu1 %2274, %v312_v36   ;;  %406 = vperm.xlu0 %2273, %v311_v37  }
  0x9b   : > { %v323_v40 = vpop.permute.xlu1 %322  ;;  %v317_v41 = vpop.permute.xlu0 %316 }
  0x9c   : > { %vm413_vm0 = vcmp.eq.s32.totalorder %v2509_v39, %v323_v40  ;;  %vm411_vm1 = vcmp.eq.s32.totalorder %v2509_v39, %v317_v41 }
  0x9d   : > { %v2065_v44 = vsel %vm413_vm0, 1.0, %v3995_v3  ;;  %v2063_v46 = vsel %vm411_vm1, 1.0, %v3995_v3 }
  0x9f   : > { %v326_v42 = vpop.permute.xlu1 %325  ;;  %v320_v43 = vpop.permute.xlu0 %319 }
  0xa0   : > { %vm414_vm2 = vcmp.eq.s32.totalorder %v2509_v39, %v326_v42  ;;  %vm412_vm3 = vcmp.eq.s32.totalorder %v2509_v39, %v320_v43 }
  0xa1   : > { %v2066_v45 = vsel %vm414_vm2, 1.0, %v3995_v3  ;;  %v2064_v47 = vsel %vm412_vm3, 1.0, %v3995_v3 }
  0xa2   : > { %v508_v48 = vpack.c.bf16 %v2066_v45, %v2065_v44  ;;  %v507_v49 = vpack.c.bf16 %v2064_v47, %v2063_v46 }
  0xa3   : > { %v332_v50 = vpop.permute.xlu1 %331  ;;  %v329_v51 = vpop.permute.xlu0 %328 }
  0xa4   : > { %vm416_vm5 = vcmp.eq.s32.totalorder %v2509_v39, %v332_v50  ;;  %vm415_vm6 = vcmp.eq.s32.totalorder %v2509_v39, %v329_v51  ;;  %2173 = vmatprep.mubr.msk.bf16.mxu0 %vm555_vm4, %v507_v49 }
  0xa5   : > { %v2068_v52 = vsel %vm416_vm5, 1.0, %v3995_v3  ;;  %v2067_v53 = vsel %vm415_vm6, 1.0, %v3995_v3  ;;  %2174 = vmatmul.mubr.msk.bf16.vlgmr.msra.gmra.mrb[0].mxu0 %vm555_vm4, %v508_v48 }
  0xa6   : > { %v509_v54 = vpack.c.bf16 %v2068_v52, %v2067_v53 }
  0xa7   : > { %v338_v55 = vpop.permute.xlu1 %337  ;;  %v335_v56 = vpop.permute.xlu0 %334 }
  0xa8   : > { %vm418_vm7 = vcmp.eq.s32.totalorder %v2509_v39, %v338_v55  ;;  %vm417_vm8 = vcmp.eq.s32.totalorder %v2509_v39, %v335_v56  ;;  %2177 = vmatprep.mubr.msk.bf16.mxu0 %vm555_vm4, %v509_v54 }
  0xa9   : > { %v2070_v57 = vsel %vm418_vm7, 1.0, %v3995_v3  ;;  %v2069_v58 = vsel %vm417_vm8, 1.0, %v3995_v3 }
  0xaa   : > { %v510_v59 = vpack.c.bf16 %v2070_v57, %v2069_v58 }
  0xab   : > { %v344_v60 = vpop.permute.xlu1 %343  ;;  %v341_v61 = vpop.permute.xlu0 %340 }
  0xac   : > { %vm420_vm9 = vcmp.eq.s32.totalorder %v2509_v39, %v344_v60  ;;  %vm419_vm10 = vcmp.eq.s32.totalorder %v2509_v39, %v341_v61 }
  0xad   : > { %v2072_v62 = vsel %vm420_vm9, 1.0, %v3995_v3  ;;  %v2071_v63 = vsel %vm419_vm10, 1.0, %v3995_v3  ;;  %2178 = vmatmul.mubr.msk.bf16.gmra.mrb[4].mxu0 %vm555_vm4, %v510_v59  ;;  %v2592_v59 = vshrl.u32 %v313_v38, 7 }
  0xae   : > { %v511_v0 = vpack.c.bf16 %v2072_v62, %v2071_v63 }
  0xaf   : > { %v350_v1 = vpop.permute.xlu1 %349  ;;  %v347_v2 = vpop.permute.xlu0 %346 }
  0xb0   : > { %vm422_vm11 = vcmp.eq.s32.totalorder %v2509_v39, %v350_v1  ;;  %vm421_vm12 = vcmp.eq.s32.totalorder %v2509_v39, %v347_v2  ;;  %2181 = vmatprep.mubr.msk.bf16.mxu0 %vm555_vm4, %v511_v0 }
  0xb1   : > { %v2074_v4 = vsel %vm422_vm11, 1.0, %v3995_v3  ;;  %v2073_v5 = vsel %vm421_vm12, 1.0, %v3995_v3 }
  0xb2   : > { %v512_v6 = vpack.c.bf16 %v2074_v4, %v2073_v5 }
  0xb3   : > { %v356_v7 = vpop.permute.xlu1 %355  ;;  %v353_v8 = vpop.permute.xlu0 %352 }
  0xb4   : > { %vm424_vm13 = vcmp.eq.s32.totalorder %v2509_v39, %v356_v7  ;;  %vm423_vm14 = vcmp.eq.s32.totalorder %v2509_v39, %v353_v8 }
  0xb5   : > { %v2076_v9 = vsel %vm424_vm13, 1.0, %v3995_v3  ;;  %v2075_v10 = vsel %vm423_vm14, 1.0, %v3995_v3  ;;  %2182 = vmatmul.mubr.msk.bf16.gmra.mrb[8].mxu0 %vm555_vm4, %v512_v6 }
  0xb6   : > { %v513_v11 = vpack.c.bf16 %v2076_v9, %v2075_v10 }
  0xb7   : > { %v362_v12 = vpop.permute.xlu1 %361  ;;  %v359_v13 = vpop.permute.xlu0 %358 }
  0xb8   : > { %vm426_vm15 = vcmp.eq.s32.totalorder %v2509_v39, %v362_v12  ;;  %vm425_vm0 = vcmp.eq.s32.totalorder %v2509_v39, %v359_v13  ;;  %2185 = vmatprep.mubr.msk.bf16.mxu0 %vm555_vm4, %v513_v11 }
  0xb9   : > { %v2078_v14 = vsel %vm426_vm15, 1.0, %v3995_v3  ;;  %v2077_v15 = vsel %vm425_vm0, 1.0, %v3995_v3 }
  0xba   : > { %v514_v16 = vpack.c.bf16 %v2078_v14, %v2077_v15 }
  0xbb   : > { %v368_v17 = vpop.permute.xlu1 %367  ;;  %v365_v18 = vpop.permute.xlu0 %364 }
  0xbc   : > { %vm428_vm1 = vcmp.eq.s32.totalorder %v2509_v39, %v368_v17  ;;  %vm427_vm2 = vcmp.eq.s32.totalorder %v2509_v39, %v365_v18 }
  0xbd   : > { %v2080_v19 = vsel %vm428_vm1, 1.0, %v3995_v3  ;;  %v2079_v20 = vsel %vm427_vm2, 1.0, %v3995_v3  ;;  %2186 = vmatmul.mubr.msk.bf16.gmra.mrb[12].mxu0 %vm555_vm4, %v514_v16  ;;  %vm836_vm2 = vcmp.lt.s32.totalorder %v2592_v59, 7 }
  0xbe   : > { %v515_v21 = vpack.c.bf16 %v2080_v19, %v2079_v20 }
  0xbf   : > { %v374_v22 = vpop.permute.xlu1 %373  ;;  %v371_v23 = vpop.permute.xlu0 %370 }
  0xc0   : > { %vm430_vm3 = vcmp.eq.s32.totalorder %v2509_v39, %v374_v22  ;;  %vm429_vm5 = vcmp.eq.s32.totalorder %v2509_v39, %v371_v23  ;;  %2189 = vmatprep.mubr.msk.bf16.mxu0 %vm555_vm4, %v515_v21 }
  0xc1   : > { %v2082_v24 = vsel %vm430_vm3, 1.0, %v3995_v3  ;;  %v2081_v25 = vsel %vm429_vm5, 1.0, %v3995_v3  ;;  %vm1034_vm3 = vcmp.lt.s32.totalorder %v2592_v59, 6  ;;  %vm1232_vm5 = vcmp.lt.s32.totalorder %v2592_v59, 5 }
  0xc2   : > { %v516_v26 = vpack.c.bf16 %v2082_v24, %v2081_v25 }
  0xc3   : > { %v380_v27 = vpop.permute.xlu1 %379  ;;  %v377_v28 = vpop.permute.xlu0 %376 }
  0xc4   : > { %vm432_vm6 = vcmp.eq.s32.totalorder %v2509_v39, %v380_v27  ;;  %vm431_vm7 = vcmp.eq.s32.totalorder %v2509_v39, %v377_v28 }
  0xc5   : > { %v2084_v29 = vsel %vm432_vm6, 1.0, %v3995_v3  ;;  %v2083_v30 = vsel %vm431_vm7, 1.0, %v3995_v3  ;;  %2190 = vmatmul.mubr.msk.bf16.gmra.mrb[16].mxu0 %vm555_vm4, %v516_v26  ;;  %vm1430_vm6 = vcmp.lt.s32.totalorder %v2592_v59, 4  ;;  %vm1856_vm7 = vcmask 1042434  }
  0xc6   : > { %v517_v31 = vpack.c.bf16 %v2084_v29, %v2083_v30 }
  0xc7   : > { %v386_v32 = vpop.permute.xlu1 %385  ;;  %v383_v33 = vpop.permute.xlu0 %382 }
  0xc8   : > { %vm434_vm8 = vcmp.eq.s32.totalorder %v2509_v39, %v386_v32  ;;  %vm433_vm9 = vcmp.eq.s32.totalorder %v2509_v39, %v383_v33  ;;  %2193 = vmatprep.mubr.msk.bf16.mxu0 %vm555_vm4, %v517_v31 }
  0xc9   : > { %v2086_v34 = vsel %vm434_vm8, 1.0, %v3995_v3  ;;  %v2085_v35 = vsel %vm433_vm9, 1.0, %v3995_v3  ;;  %vm1859_vm8 = vcmask 1043459   ;;  %vm1862_vm9 = vcmask 1044484  }
  0xca   : > { %v518_v36 = vpack.c.bf16 %v2086_v34, %v2085_v35 }
  0xcb   : > { %v392_v37 = vpop.permute.xlu1 %391  ;;  %v389_v40 = vpop.permute.xlu0 %388 }
  0xcc   : > { %vm436_vm10 = vcmp.eq.s32.totalorder %v2509_v39, %v392_v37  ;;  %vm435_vm11 = vcmp.eq.s32.totalorder %v2509_v39, %v389_v40 }
  0xcd   : > { %v2088_v41 = vsel %vm436_vm10, 1.0, %v3995_v3  ;;  %v2087_v42 = vsel %vm435_vm11, 1.0, %v3995_v3  ;;  %2194 = vmatmul.mubr.msk.bf16.gmra.mrb[20].mxu0 %vm555_vm4, %v518_v36  ;;  %vm1865_vm10 = vcmask 1045509   ;;  %vm2365_vm11 = vmmov 0  }
  0xce   : > { %v519_v43 = vpack.c.bf16 %v2088_v41, %v2087_v42 }
  0xcf   : > { %v398_v44 = vpop.permute.xlu1 %397  ;;  %v395_v45 = vpop.permute.xlu0 %394 }
  0xd0   : > { %vm438_vm12 = vcmp.eq.s32.totalorder %v2509_v39, %v398_v44  ;;  %vm437_vm13 = vcmp.eq.s32.totalorder %v2509_v39, %v395_v45  ;;  %2197 = vmatprep.mubr.msk.bf16.mxu0 %vm555_vm4, %v519_v43 }
  0xd1   : > { %v2090_v46 = vsel %vm438_vm12, 1.0, %v3995_v3  ;;  %v2089_v47 = vsel %vm437_vm13, 1.0, %v3995_v3  ;;  %vm1868_vm12 = vcmask 1046534   ;;  %vm1871_vm13 = vcmask 1047559  }
  0xd2   : > { %v520_v48 = vpack.c.bf16 %v2090_v46, %v2089_v47 }
  0xd3   : > { %v404_v49 = vpop.permute.xlu1 %403  ;;  %v401_v50 = vpop.permute.xlu0 %400 }
  0xd4   : > { %vm440_vm14 = vcmp.eq.s32.totalorder %v2509_v39, %v404_v49  ;;  %vm439_vm15 = vcmp.eq.s32.totalorder %v2509_v39, %v401_v50 }
  0xd5   : > { %v2092_v51 = vsel %vm440_vm14, 1.0, %v3995_v3  ;;  %v2091_v52 = vsel %vm439_vm15, 1.0, %v3995_v3  ;;  %2198 = vmatmul.mubr.msk.bf16.gmra.mrb[24].mxu0 %vm555_vm4, %v520_v48 }
  0xd6   : > { %v521_v53 = vpack.c.bf16 %v2092_v51, %v2091_v52 }
  0xd7   : > { %v410_v54 = vpop.permute.xlu1 %409  ;;  %v407_v55 = vpop.permute.xlu0 %406 }
  0xd8   : > { %vm442_vm0 = vcmp.eq.s32.totalorder %v2509_v39, %v410_v54  ;;  %vm441_vm1 = vcmp.eq.s32.totalorder %v2509_v39, %v407_v55  ;;  %2201 = vmatprep.mubr.msk.bf16.mxu0 %vm555_vm4, %v521_v53 }
  0xd9   : > { %v2094_v56 = vsel %vm442_vm0, 1.0, %v3995_v3  ;;  %v2093_v57 = vsel %vm441_vm1, 1.0, %v3995_v3 }
  0xda   : > { %v522_v58 = vpack.c.bf16 %v2094_v56, %v2093_v57 }
  0xdd   : > { %2202 = vmatmul.mubr.msk.bf16.gmra.mrb[28].mxu0 %vm555_vm4, %v522_v58  ;;  %vm1853_vm4 = vcmask 1041409  }
 0x178   : > { %v2594_v60 = vpop.f32.mrb[0].mxu0 }
 0x179   : > { %4032 = vst [vmem:[#allocation5_spill] sm:$0xff] %v2594_v60  ;;  %v2600_v39 = vpop.f32.mrb[1].mxu0  ;;  %v804_v61 = vrot.slane %v2594_v60, 1  ;;  %v1004_v62 = vrot.slane %v2594_v60, 2  ;;  %v1202_v63 = vrot.slane %v2594_v60, 3  ;;  %v1400_v38 = vrot.slane %v2594_v60, 4 }
 0x17a   : > { %v2606_v0 = vpop.f32.mrb[2].mxu0  ;;  %v4000_v1 = vrot.slane %v2600_v39, 1  ;;  %v3999_v2 = vrot.slane %v2600_v39, 2  ;;  %v3998_v4 = vrot.slane %v2600_v39, 3  ;;  %v3997_v5 = vrot.slane %v2600_v39, 4 }
 0x17b   : > { %4033 = vst [vmem:[#allocation6_spill] sm:$0xff] %v2606_v0  ;;  %v2612_v6 = vpop.f32.mrb[3].mxu0  ;;  %v805_v7 = vrot.slane %v2606_v0, 1  ;;  %v1005_v8 = vrot.slane %v2606_v0, 2  ;;  %v1203_v9 = vrot.slane %v2606_v0, 3  ;;  %v1401_v10 = vrot.slane %v2606_v0, 4 }
 0x17c   : > { %4034 = vst [vmem:[#allocation7_spill] sm:$0xff] %v2612_v6  ;;  %v803_v11 = vrot.slane %v2612_v6, 1  ;;  %v1003_v12 = vrot.slane %v2612_v6, 2  ;;  %v1201_v13 = vrot.slane %v2612_v6, 3  ;;  %v1399_v14 = vrot.slane %v2612_v6, 4 }
 0x17d   : > { %v865_v15 = vsel %vm836_vm2, %v804_v61, %v805_v7  ;;  %v1063_v16 = vsel %vm1034_vm3, %v1004_v62, %v1005_v8  ;;  %v1261_v17 = vsel %vm1232_vm5, %v1202_v63, %v1203_v9  ;;  %v1459_v18 = vsel %vm1430_vm6, %v1400_v38, %v1401_v10 }
 0x17e   : > { %873 = vrot.lane.b32.xlu0 %v865_v15, %s2361_s9  ;;  %v866_v19 = vsel %vm836_vm2, %v803_v11, %v804_v61  ;;  %v1064_v20 = vsel %vm1034_vm3, %v1003_v12, %v1004_v62  ;;  %v1262_v21 = vsel %vm1232_vm5, %v1201_v13, %v1202_v63  ;;  %v1460_v22 = vsel %vm1430_vm6, %v1399_v14, %v1400_v38 }
 0x17f   : > { %871 = vrot.lane.b32.xlu1 %v866_v19, %s2361_s9  ;;  %v2644_v23 = vsel %vm836_vm2, %v4000_v1, %v803_v11  ;;  %v2650_v24 = vsel %vm1034_vm3, %v3999_v2, %v1003_v12  ;;  %v2656_v25 = vsel %vm1232_vm5, %v3998_v4, %v1201_v13  ;;  %v2662_v26 = vsel %vm1430_vm6, %v3997_v5, %v1399_v14 }
 0x180   : > { %v2664_v27 = vpop.f32.mrb[4].mxu0 }
 0x181   : > { %4035 = vst [vmem:[#allocation8_spill] sm:$0xff] %v2664_v27  ;;  %v2666_v28 = vpop.f32.mrb[5].mxu0  ;;  %v808_v29 = vrot.slane %v2664_v27, 1  ;;  %v1008_v30 = vrot.slane %v2664_v27, 2  ;;  %v1206_v31 = vrot.slane %v2664_v27, 3  ;;  %v1404_v32 = vrot.slane %v2664_v27, 4 }
 0x182   : > { %4036 = vst [vmem:[#allocation9_spill] sm:$0xff] %v2666_v28  ;;  %1071 = vrot.lane.b32.xlu0 %v1063_v16, %s2362_s13  ;;  %v2673_v33 = vpop.f32.mrb[6].mxu0  ;;  %v806_v34 = vrot.slane %v2666_v28, 1  ;;  %v1006_v35 = vrot.slane %v2666_v28, 2  ;;  %v1204_v36 = vrot.slane %v2666_v28, 3  ;;  %v1402_v37 = vrot.slane %v2666_v28, 4 }
 0x183   : > { %4037 = vst [vmem:[#allocation10_spill] sm:$0xff] %v2673_v33  ;;  %1069 = vrot.lane.b32.xlu1 %v1064_v20, %s2362_s13  ;;  %v2680_v40 = vpop.f32.mrb[7].mxu0  ;;  %v809_v41 = vrot.slane %v2673_v33, 1  ;;  %v1009_v42 = vrot.slane %v2673_v33, 2  ;;  %v1207_v43 = vrot.slane %v2673_v33, 3  ;;  %v1405_v44 = vrot.slane %v2673_v33, 4 }
 0x184   : > { %4038 = vst [vmem:[#allocation11_spill] sm:$0xff] %v2680_v40  ;;  %v864_v45 = vsel %vm836_vm2, %v805_v7, %v806_v34  ;;  %v2690_v46 = vsel %vm1034_vm3, %v1005_v8, %v1006_v35  ;;  %v2694_v47 = vsel %vm1232_vm5, %v1203_v9, %v1204_v36  ;;  %v2698_v48 = vsel %vm1430_vm6, %v1401_v10, %v1402_v37 }
 0x185   : > { %v2702_v49 = vsel %vm836_vm2, %v808_v29, %v809_v41  ;;  %v807_v50 = vrot.slane %v2680_v40, 1  ;;  %v2707_v51 = vsel %vm1034_vm3, %v1008_v30, %v1009_v42  ;;  %v1007_v52 = vrot.slane %v2680_v40, 2 }
 0x186   : > { %1269 = vrot.lane.b32.xlu0 %v1261_v17, %s2363_s14  ;;  %v2713_v53 = vsel %vm1232_vm5, %v1206_v31, %v1207_v43  ;;  %v1205_v54 = vrot.slane %v2680_v40, 3  ;;  %v2718_v55 = vsel %vm1430_vm6, %v1404_v32, %v1405_v44  ;;  %v1403_v56 = vrot.slane %v2680_v40, 4 }
 0x187   : > { %1267 = vrot.lane.b32.xlu1 %v1262_v21, %s2363_s14  ;;  %v2724_v57 = vsel %vm836_vm2, %v807_v50, %v808_v29  ;;  %v2728_v58 = vsel %vm1034_vm3, %v1007_v52, %v1008_v30  ;;  %v2732_v61 = vsel %vm836_vm2, %v806_v34, %v807_v50  ;;  %v2736_v62 = vsel %vm1034_vm3, %v1006_v35, %v1007_v52 }
 0x188   : > { %v2738_v63 = vpop.f32.mrb[8].mxu0  ;;  %v2742_v38 = vsel %vm1232_vm5, %v1205_v54, %v1206_v31  ;;  %v2746_v7 = vsel %vm1430_vm6, %v1403_v56, %v1404_v32  ;;  %v2750_v8 = vsel %vm1232_vm5, %v1204_v36, %v1205_v54  ;;  %v2754_v9 = vsel %vm1430_vm6, %v1402_v37, %v1403_v56 }
 0x189   : > { %4039 = vst [vmem:[#allocation12_spill] sm:$0xff] %v2738_v63  ;;  %v2756_v10 = vpop.f32.mrb[9].mxu0  ;;  %v812_v11 = vrot.slane %v2738_v63, 1  ;;  %v1012_v12 = vrot.slane %v2738_v63, 2  ;;  %v1210_v13 = vrot.slane %v2738_v63, 3  ;;  %v1408_v14 = vrot.slane %v2738_v63, 4 }
 0x18a   : > { %4040 = vst [vmem:[#allocation13_spill] sm:$0xff] %v2756_v10  ;;  %1467 = vrot.lane.b32.xlu0 %v1459_v18, %s2364_s15  ;;  %v2763_v15 = vpop.f32.mrb[10].mxu0  ;;  %v810_v16 = vrot.slane %v2756_v10, 1  ;;  %v1010_v17 = vrot.slane %v2756_v10, 2  ;;  %v1208_v19 = vrot.slane %v2756_v10, 3  ;;  %v1406_v20 = vrot.slane %v2756_v10, 4 }
 0x18b   : > { %4041 = vst [vmem:[#allocation14_spill] sm:$0xff] %v2763_v15  ;;  %1465 = vrot.lane.b32.xlu1 %v1460_v22, %s2364_s15  ;;  %v2770_v21 = vpop.f32.mrb[11].mxu0  ;;  %v813_v29 = vrot.slane %v2763_v15, 1  ;;  %v1013_v30 = vrot.slane %v2763_v15, 2  ;;  %v1211_v18 = vrot.slane %v2763_v15, 3  ;;  %v1409_v31 = vrot.slane %v2763_v15, 4 }
 0x18c   : > { %4042 = vst [vmem:[#allocation15_spill] sm:$0xff] %v2770_v21  ;;  %v2778_v32 = vsel %vm836_vm2, %v809_v41, %v810_v16  ;;  %v2782_v34 = vsel %vm1034_vm3, %v1009_v42, %v1010_v17  ;;  %v2786_v22 = vsel %vm1232_vm5, %v1207_v43, %v1208_v19  ;;  %v2790_v35 = vsel %vm1430_vm6, %v1405_v44, %v1406_v20 }
 0x18d   : > { %v2794_v36 = vsel %vm836_vm2, %v812_v11, %v813_v29  ;;  %v811_v37 = vrot.slane %v2770_v21, 1  ;;  %v2799_v41 = vsel %vm1034_vm3, %v1012_v12, %v1013_v30  ;;  %v1011_v42 = vrot.slane %v2770_v21, 2 }
 0x18e   : > { %869 = vrot.lane.b32.xlu0 %v2644_v23, %s2361_s9  ;;  %v2806_v43 = vsel %vm1232_vm5, %v1210_v13, %v1211_v18  ;;  %v1209_v44 = vrot.slane %v2770_v21, 3  ;;  %v2811_v50 = vsel %vm1430_vm6, %v1408_v14, %v1409_v31  ;;  %v1407_v52 = vrot.slane %v2770_v21, 4 }
 0x18f   : > { %875 = vrot.lane.b32.xlu1 %v864_v45, %s2361_s9  ;;  %v2817_v54 = vsel %vm836_vm2, %v811_v37, %v812_v11  ;;  %v2821_v23 = vsel %vm1034_vm3, %v1011_v42, %v1012_v12  ;;  %v2825_v56 = vsel %vm836_vm2, %v810_v16, %v811_v37  ;;  %v2829_v3 = vsel %vm1034_vm3, %v1010_v17, %v1011_v42 }
 0x190   : > { %v2831_v5 = vpop.f32.mrb[12].mxu0  ;;  %v2835_v45 = vsel %vm1232_vm5, %v1209_v44, %v1210_v13  ;;  %v2839_v11 = vsel %vm1430_vm6, %v1407_v52, %v1408_v14  ;;  %v2843_v12 = vsel %vm1232_vm5, %v1208_v19, %v1209_v44  ;;  %v2847_v16 = vsel %vm1430_vm6, %v1406_v20, %v1407_v52 }
 0x191   : > { %4043 = vst [vmem:[#allocation16_spill] sm:$0xff] %v2831_v5  ;;  %v2849_v17 = vpop.f32.mrb[13].mxu0  ;;  %v816_v37 = vrot.slane %v2831_v5, 1  ;;  %v1016_v42 = vrot.slane %v2831_v5, 2  ;;  %v1214_v13 = vrot.slane %v2831_v5, 3  ;;  %v1412_v4 = vrot.slane %v2831_v5, 4 }
 0x192   : > { %4044 = vst [vmem:[#allocation17_spill] sm:$0xff] %v2849_v17  ;;  %1067 = vrot.lane.b32.xlu0 %v2650_v24, %s2362_s13  ;;  %v2857_v14 = vpop.f32.mrb[14].mxu0  ;;  %v814_v19 = vrot.slane %v2849_v17, 1  ;;  %v1014_v20 = vrot.slane %v2849_v17, 2  ;;  %v1212_v44 = vrot.slane %v2849_v17, 3  ;;  %v1410_v52 = vrot.slane %v2849_v17, 4 }
 0x193   : > { %4045 = vst [vmem:[#allocation18_spill] sm:$0xff] %v2857_v14  ;;  %1073 = vrot.lane.b32.xlu1 %v2690_v46, %s2362_s13  ;;  %v2865_v2 = vpop.f32.mrb[15].mxu0  ;;  %v817_v1 = vrot.slane %v2857_v14, 1  ;;  %v1017_v5 = vrot.slane %v2857_v14, 2  ;;  %v1215_v24 = vrot.slane %v2857_v14, 3  ;;  %v1413_v15 = vrot.slane %v2857_v14, 4 }
 0x194   : > { %4046 = vst [vmem:[#allocation19_spill] sm:$0xff] %v2865_v2  ;;  %v2873_v10 = vsel %vm836_vm2, %v813_v29, %v814_v19  ;;  %v2877_v17 = vsel %vm1034_vm3, %v1013_v30, %v1014_v20  ;;  %v2881_v46 = vsel %vm1232_vm5, %v1211_v18, %v1212_v44  ;;  %v2885_v21 = vsel %vm1430_vm6, %v1409_v31, %v1410_v52 }
 0x195   : > { %v2889_v63 = vsel %vm836_vm2, %v816_v37, %v817_v1  ;;  %v815_v14 = vrot.slane %v2865_v2, 1  ;;  %v2894_v29 = vsel %vm1034_vm3, %v1016_v42, %v1017_v5  ;;  %v1015_v30 = vrot.slane %v2865_v2, 2 }
 0x196   : > { %1265 = vrot.lane.b32.xlu0 %v2656_v25, %s2363_s14  ;;  %v2901_v18 = vsel %vm1232_vm5, %v1214_v13, %v1215_v24  ;;  %v1213_v31 = vrot.slane %v2865_v2, 3  ;;  %v2906_v33 = vsel %vm1430_vm6, %v1412_v4, %v1413_v15  ;;  %v1411_v28 = vrot.slane %v2865_v2, 4 }
 0x197   : > { %1271 = vrot.lane.b32.xlu1 %v2694_v47, %s2363_s14  ;;  %v2913_v40 = vsel %vm836_vm2, %v815_v14, %v816_v37  ;;  %v2917_v25 = vsel %vm1034_vm3, %v1015_v30, %v1016_v42  ;;  %v2921_v27 = vsel %vm836_vm2, %v814_v19, %v815_v14  ;;  %v2925_v0 = vsel %vm1034_vm3, %v1014_v20, %v1015_v30 }
 0x198   : > { %4047 = vst [vmem:[#allocation20_spill] sm:$0xff] %v2921_v27  ;;  %4048 = vst [vmem:[#allocation21_spill] sm:$0xff] %v2925_v0  ;;  %v2927_v2 = vpop.f32.mrb[16].mxu0  ;;  %v2931_v47 = vsel %vm1232_vm5, %v1213_v31, %v1214_v13  ;;  %v2935_v37 = vsel %vm1430_vm6, %v1411_v28, %v1412_v4  ;;  %v2939_v42 = vsel %vm1232_vm5, %v1212_v44, %v1213_v31 }
 0x199   : > { %4049 = vst [vmem:[#allocation22_spill] sm:$0xff] %v2927_v2  ;;  %4050 = vst [vmem:[#allocation23_spill] sm:$0xff] %v2935_v37  ;;  %v2943_v14 = vsel %vm1430_vm6, %v1410_v52, %v1411_v28  ;;  %v2945_v19 = vpop.f32.mrb[17].mxu0  ;;  %v820_v20 = vrot.slane %v2927_v2, 1  ;;  %v1020_v30 = vrot.slane %v2927_v2, 2  ;;  %v1218_v13 = vrot.slane %v2927_v2, 3 }
 0x19a   : > { %4051 = vst [vmem:[#allocation24_spill] sm:$0xff] %v2939_v42  ;;  %4052 = vst [vmem:[#allocation25_spill] sm:$0xff] %v2943_v14  ;;  %v1416_v60 = vrot.slane %v2927_v2, 4  ;;  %1463 = vrot.lane.b32.xlu0 %v2662_v26, %s2364_s15  ;;  %v2953_v4 = vpop.f32.mrb[18].mxu0  ;;  %v818_v44 = vrot.slane %v2945_v19, 1  ;;  %v1018_v28 = vrot.slane %v2945_v19, 2 }
 0x19b   : > { %4053 = vst [vmem:[#allocation26_spill] sm:$0xff] %v2945_v19  ;;  %4054 = vst [vmem:[#allocation27_spill] sm:$0xff] %v2953_v4  ;;  %v1216_v52 = vrot.slane %v2945_v19, 3  ;;  %v1414_v31 = vrot.slane %v2945_v19, 4  ;;  %1469 = vrot.lane.b32.xlu1 %v2698_v48, %s2364_s15  ;;  %v2961_v6 = vpop.f32.mrb[19].mxu0  ;;  %v821_v2 = vrot.slane %v2953_v4, 1 }
 0x19c   : > { %4055 = vst [vmem:[#allocation28_spill] sm:$0xff] %v2961_v6  ;;  %v1021_v14 = vrot.slane %v2953_v4, 2  ;;  %v1219_v26 = vrot.slane %v2953_v4, 3  ;;  %v1417_v42 = vrot.slane %v2953_v4, 4  ;;  %v2969_v0 = vsel %vm836_vm2, %v817_v1, %v818_v44 }
 0x19d   : > { %v2973_v19 = vsel %vm1034_vm3, %v1017_v5, %v1018_v28  ;;  %v2977_v48 = vsel %vm1232_vm5, %v1215_v24, %v1216_v52  ;;  %v2981_v27 = vsel %vm1430_vm6, %v1413_v15, %v1414_v31  ;;  %v2985_v37 = vsel %vm836_vm2, %v820_v20, %v821_v2 }
 0x19e   : > { %4056 = vst [vmem:[#allocation29_spill] sm:$0xff] %v2977_v48  ;;  %4057 = vst [vmem:[#allocation30_spill] sm:$0xff] %v2981_v27  ;;  %v819_v4 = vrot.slane %v2961_v6, 1  ;;  %v2990_v1 = vsel %vm1034_vm3, %v1020_v30, %v1021_v14  ;;  %v1019_v5 = vrot.slane %v2961_v6, 2  ;;  %881 = vrot.lane.b32.xlu0 %v2702_v49, %s2361_s9  ;;  %v2997_v24 = vsel %vm1232_vm5, %v1218_v13, %v1219_v26 }
 0x19f   : > { %4058 = vst [vmem:[#allocation31_spill] sm:$0xff] %v2985_v37  ;;  %4059 = vst [vmem:[#allocation32_spill] sm:$0xff] %v2990_v1  ;;  %v1217_v15 = vrot.slane %v2961_v6, 3  ;;  %v3002_v37 = vsel %vm1430_vm6, %v1416_v60, %v1417_v42  ;;  %v1415_v27 = vrot.slane %v2961_v6, 4  ;;  %879 = vrot.lane.b32.xlu1 %v2724_v57, %s2361_s9  ;;  %v4110_v59 = vld [vmem:[#allocation20_spill] sm:$0xff] }
 0x1a0   : > { %4060 = vst [vmem:[#allocation33_spill] sm:$0xff] %v2997_v24  ;;  %v3009_v1 = vsel %vm836_vm2, %v819_v4, %v820_v20  ;;  %v3013_v49 = vsel %vm1034_vm3, %v1019_v5, %v1020_v30  ;;  %v3017_v24 = vsel %vm836_vm2, %v818_v44, %v819_v4  ;;  %v3019_v48 = vpop.f32.mrb[20].mxu0  ;;  %v3031_v20 = vsel %vm1034_vm3, %v1018_v28, %v1019_v5 }
 0x1a1   : > { %4061 = vst [vmem:[#allocation34_spill] sm:$0xff] %v3017_v24  ;;  %4062 = vst [vmem:[#allocation35_spill] sm:$0xff] %v3019_v48  ;;  %v3023_v6 = vsel %vm1232_vm5, %v1217_v15, %v1218_v13  ;;  %v3027_v57 = vsel %vm1430_vm6, %v1415_v27, %v1416_v60  ;;  %v3033_v30 = vpop.f32.mrb[21].mxu0  ;;  %v3037_v4 = vsel %vm1232_vm5, %v1216_v52, %v1217_v15 }
 0x1a2   : > { %4063 = vst [vmem:[#allocation36_spill] sm:$0xff] %v3027_v57  ;;  %4064 = vst [vmem:[#allocation37_spill] sm:$0xff] %v3031_v20  ;;  %v3041_v44 = vsel %vm1430_vm6, %v1414_v31, %v1415_v27  ;;  %1079 = vrot.lane.b32.xlu0 %v2707_v51, %s2362_s13  ;;  %v3045_v13 = vpop.f32.mrb[22].mxu0  ;;  %v822_v60 = vrot.slane %v3033_v30, 1  ;;  %v1022_v28 = vrot.slane %v3033_v30, 2  ;;  %v1220_v5 = vrot.slane %v3033_v30, 3 }
 0x1a3   : > { %4065 = vst [vmem:[#allocation38_spill] sm:$0xff] %v3033_v30  ;;  %4066 = vst [vmem:[#allocation39_spill] sm:$0xff] %v3037_v4  ;;  %v1418_v20 = vrot.slane %v3033_v30, 4  ;;  %1077 = vrot.lane.b32.xlu1 %v2728_v58, %s2362_s13  ;;  %v3053_v52 = vpop.f32.mrb[23].mxu0  ;;  %v824_v27 = vrot.slane %v3019_v48, 1  ;;  %v825_v31 = vrot.slane %v3045_v13, 1 }
 0x1a4   : > { %4067 = vst [vmem:[#allocation40_spill] sm:$0xff] %v3041_v44  ;;  %4068 = vst [vmem:[#allocation41_spill] sm:$0xff] %v3045_v13  ;;  %v1024_v51 = vrot.slane %v3019_v48, 2  ;;  %v1025_v15 = vrot.slane %v3045_v13, 2  ;;  %v3061_v44 = vsel %vm836_vm2, %v821_v2, %v822_v60  ;;  %v3065_v30 = vsel %vm1034_vm3, %v1021_v14, %v1022_v28 }
 0x1a5   : > { %4069 = vst [vmem:[#allocation42_spill] sm:$0xff] %v3053_v52  ;;  %4070 = vst [vmem:[#allocation43_spill] sm:$0xff] %v3061_v44  ;;  %v3069_v58 = vsel %vm1232_vm5, %v1219_v26, %v1220_v5  ;;  %v3073_v4 = vsel %vm1430_vm6, %v1417_v42, %v1418_v20  ;;  %v3077_v24 = vsel %vm836_vm2, %v824_v27, %v825_v31  ;;  %v823_v57 = vrot.slane %v3053_v52, 1 }
 0x1a6   : > { %4071 = vst [vmem:[#allocation44_spill] sm:$0xff] %v3065_v30  ;;  %4072 = vst [vmem:[#allocation45_spill] sm:$0xff] %v3069_v58  ;;  %v3082_v2 = vsel %vm1034_vm3, %v1024_v51, %v1025_v15  ;;  %v1023_v14 = vrot.slane %v3053_v52, 2  ;;  %1277 = vrot.lane.b32.xlu0 %v2713_v53, %s2363_s14  ;;  %v1222_v26 = vrot.slane %v3019_v48, 3  ;;  %v1223_v42 = vrot.slane %v3045_v13, 3 }
 0x1a7   : > { %4073 = vst [vmem:[#allocation46_spill] sm:$0xff] %v3073_v4  ;;  %4074 = vst [vmem:[#allocation47_spill] sm:$0xff] %v3077_v24  ;;  %v1221_v4 = vrot.slane %v3053_v52, 3  ;;  %v1420_v58 = vrot.slane %v3019_v48, 4  ;;  %1275 = vrot.lane.b32.xlu1 %v2742_v38, %s2363_s14  ;;  %v3095_v24 = vsel %vm836_vm2, %v823_v57, %v824_v27  ;;  %v1421_v53 = vrot.slane %v3045_v13, 4 }
 0x1a8   : > { %4075 = vst [vmem:[#allocation48_spill] sm:$0xff] %v3082_v2  ;;  %v3099_v2 = vsel %vm1034_vm3, %v1023_v14, %v1024_v51  ;;  %v1419_v30 = vrot.slane %v3053_v52, 4  ;;  %v3103_v44 = vpop.f32.mrb[24].mxu0  ;;  %v3107_v48 = vsel %vm1232_vm5, %v1222_v26, %v1223_v42  ;;  %v3115_v27 = vsel %vm836_vm2, %v822_v60, %v823_v57 }
 0x1a9   : > { %4076 = vst [vmem:[#allocation49_spill] sm:$0xff] %v3103_v44  ;;  %4077 = vst [vmem:[#allocation50_spill] sm:$0xff] %v3107_v48  ;;  %v3111_v38 = vsel %vm1232_vm5, %v1221_v4, %v1222_v26  ;;  %v3117_v51 = vpop.f32.mrb[25].mxu0  ;;  %v3121_v13 = vsel %vm1430_vm6, %v1420_v58, %v1421_v53  ;;  %v3129_v48 = vsel %vm1034_vm3, %v1022_v28, %v1023_v14 }
 0x1aa   : > { %4078 = vst [vmem:[#allocation51_spill] sm:$0xff] %v3115_v27  ;;  %4079 = vst [vmem:[#allocation52_spill] sm:$0xff] %v3117_v51  ;;  %v3125_v52 = vsel %vm1430_vm6, %v1419_v30, %v1420_v58  ;;  %1475 = vrot.lane.b32.xlu0 %v2718_v55, %s2364_s15  ;;  %v3133_v26 = vpop.f32.mrb[26].mxu0  ;;  %v826_v57 = vrot.slane %v3117_v51, 1  ;;  %v1026_v60 = vrot.slane %v3117_v51, 2  ;;  %v3139_v27 = vsel %vm1232_vm5, %v1220_v5, %v1221_v4 }
 0x1ab   : > { %4080 = vst [vmem:[#allocation53_spill] sm:$0xff] %v3125_v52  ;;  %4081 = vst [vmem:[#allocation54_spill] sm:$0xff] %v3129_v48  ;;  %v1224_v58 = vrot.slane %v3117_v51, 3  ;;  %1473 = vrot.lane.b32.xlu1 %v2746_v7, %s2364_s15  ;;  %v3144_v28 = vpop.f32.mrb[27].mxu0  ;;  %v3148_v55 = vsel %vm1430_vm6, %v1418_v20, %v1419_v30  ;;  %v1422_v14 = vrot.slane %v3117_v51, 4  ;;  %v828_v48 = vrot.slane %v3103_v44, 1 }
 0x1ac   : > { %4082 = vst [vmem:[#allocation55_spill] sm:$0xff] %v3133_v26  ;;  %4083 = vst [vmem:[#allocation56_spill] sm:$0xff] %v3139_v27  ;;  %v829_v52 = vrot.slane %v3133_v26, 1  ;;  %v3155_v4 = vsel %vm836_vm2, %v825_v31, %v826_v57  ;;  %v3159_v5 = vsel %vm1034_vm3, %v1025_v15, %v1026_v60  ;;  %v827_v20 = vrot.slane %v3144_v28, 1 }
 0x1ad   : > { %4084 = vst [vmem:[#allocation57_spill] sm:$0xff] %v3144_v28  ;;  %4085 = vst [vmem:[#allocation58_spill] sm:$0xff] %v3148_v55  ;;  %v3163_v7 = vsel %vm1232_vm5, %v1223_v42, %v1224_v58  ;;  %v3168_v30 = vsel %vm1430_vm6, %v1421_v53, %v1422_v14  ;;  %v1028_v15 = vrot.slane %v3103_v44, 2  ;;  %v1029_v42 = vrot.slane %v3133_v26, 2 }
 0x1ae   : > { %4086 = vst [vmem:[#allocation59_spill] sm:$0xff] %v3155_v4  ;;  %4087 = vst [vmem:[#allocation60_spill] sm:$0xff] %v3159_v5  ;;  %v3172_v51 = vsel %vm836_vm2, %v828_v48, %v829_v52  ;;  %877 = vrot.lane.b32.xlu0 %v2732_v61, %s2361_s9  ;;  %v3178_v31 = vsel %vm836_vm2, %v827_v20, %v828_v48  ;;  %v1027_v55 = vrot.slane %v3144_v28, 2  ;;  %v1226_v53 = vrot.slane %v3103_v44, 3 }
 0x1af   : > { %4088 = vst [vmem:[#allocation61_spill] sm:$0xff] %v3163_v7  ;;  %4089 = vst [vmem:[#allocation62_spill] sm:$0xff] %v3168_v30  ;;  %883 = vrot.lane.b32.xlu1 %v2778_v32, %s2361_s9  ;;  %v1225_v30 = vrot.slane %v3144_v28, 3  ;;  %v1424_v61 = vrot.slane %v3103_v44, 4  ;;  %v3193_v48 = vsel %vm1034_vm3, %v1028_v15, %v1029_v42  ;;  %v1425_v32 = vrot.slane %v3133_v26, 4 }
 0x1b0   : > { %4090 = vst [vmem:[#allocation63_spill] sm:$0xff] %v3172_v51  ;;  %4091 = vst [vmem:[#allocation64_spill] sm:$0xff] %v3178_v31  ;;  %v1227_v51 = vrot.slane %v3133_v26, 3  ;;  %v3189_v7 = vpop.f32.mrb[28].mxu0  ;;  %v3197_v31 = vsel %vm1034_vm3, %v1027_v55, %v1028_v15  ;;  %v1423_v27 = vrot.slane %v3144_v28, 4 }
 0x1b1   : > { %4092 = vst [vmem:[#allocation65_spill] sm:$0xff] %v3193_v48  ;;  %v3201_v5 = vpop.f32.mrb[29].mxu0  ;;  %v3209_v44 = vsel %vm1232_vm5, %v1225_v30, %v1226_v53  ;;  %v3213_v48 = vsel %vm836_vm2, %v826_v57, %v827_v20  ;;  %v3221_v26 = vsel %vm1430_vm6, %v1424_v61, %v1425_v32 }
 0x1b2   : > { %4093 = vst [vmem:[#allocation66_spill] sm:$0xff] %v3201_v5  ;;  %v3205_v4 = vsel %vm1232_vm5, %v1226_v53, %v1227_v51  ;;  %4094 = vst [vmem:[#allocation67_spill] sm:$0xff] %v3213_v48  ;;  %1075 = vrot.lane.b32.xlu0 %v2736_v62, %s2362_s13  ;;  %v3217_v15 = vpop.f32.mrb[30].mxu0  ;;  %v3225_v28 = vsel %vm1430_vm6, %v1423_v27, %v1424_v61  ;;  %v830_v53 = vrot.slane %v3201_v5, 1  ;;  %v1030_v20 = vrot.slane %v3201_v5, 2 }
 0x1b3   : > { %4095 = vst [vmem:[#allocation68_spill] sm:$0xff] %v3221_v26  ;;  %4096 = vst [vmem:[#allocation69_spill] sm:$0xff] %v3225_v28  ;;  %1081 = vrot.lane.b32.xlu1 %v2782_v34, %s2362_s13  ;;  %v3230_v57 = vpop.f32.mrb[31].mxu0  ;;  %v3234_v62 = vsel %vm1034_vm3, %v1026_v60, %v1027_v55  ;;  %v3239_v48 = vsel %vm1232_vm5, %v1224_v58, %v1225_v30  ;;  %v1228_v61 = vrot.slane %v3201_v5, 3 }
 0x1b4   : > { %4097 = vst [vmem:[#allocation70_spill] sm:$0xff] %v3230_v57  ;;  %4098 = vst [vmem:[#allocation71_spill] sm:$0xff] %v3234_v62  ;;  %v831_v28 = vrot.slane %v3230_v57, 1  ;;  %v1031_v26 = vrot.slane %v3230_v57, 2  ;;  %v3246_v34 = vsel %vm836_vm2, %v829_v52, %v830_v53  ;;  %v3250_v60 = vsel %vm1034_vm3, %v1029_v42, %v1030_v20 }
 0x1b5   : > { %4099 = vst [vmem:[#allocation72_spill] sm:$0xff] %v3239_v48  ;;  %4100 = vst [vmem:[#allocation73_spill] sm:$0xff] %v3250_v60  ;;  %v3254_v55 = vsel %vm1232_vm5, %v1227_v51, %v1228_v61  ;;  %v3258_v58 = vsel %vm1430_vm6, %v1422_v14, %v1423_v27  ;;  %v1229_v30 = vrot.slane %v3230_v57, 3  ;;  %v1426_v52 = vrot.slane %v3201_v5, 4 }
 0x1b6   : > { %4101 = vst [vmem:[#allocation74_spill] sm:$0xff] %v3254_v55  ;;  %4102 = vst [vmem:[#allocation75_spill] sm:$0xff] %v3258_v58  ;;  %1273 = vrot.lane.b32.xlu0 %v2750_v8, %s2363_s14  ;;  %v832_v48 = vrot.slane %v3189_v7, 1  ;;  %v833_v42 = vrot.slane %v3217_v15, 1  ;;  %v1427_v60 = vrot.slane %v3230_v57, 4  ;;  %v1032_v51 = vrot.slane %v3189_v7, 2 }
 0x1b7   : > { %1279 = vrot.lane.b32.xlu1 %v2786_v22, %s2363_s14  ;;  %v1033_v27 = vrot.slane %v3217_v15, 2  ;;  %v1230_v14 = vrot.slane %v3189_v7, 3  ;;  %v3274_v8 = vsel %vm1430_vm6, %v1425_v32, %v1426_v52  ;;  %v4104_v58 = vrot.slane %v2600_v39, 1 }
 0x1b8   : > { %v3278_v5 = vsel %vm836_vm2, %v832_v48, %v833_v42  ;;  %v1231_v22 = vrot.slane %v3217_v15, 3  ;;  %v4106_v62 = vrot.slane %v2600_v39, 2 }
 0x1b9   : > { %4103 = vst [vmem:[#allocation76_spill] sm:$0xff] %v3278_v5  ;;  %v3284_v57 = vsel %vm836_vm2, %v833_v42, %v4104_v58  ;;  %v3289_v55 = vsel %vm1034_vm3, %v1032_v51, %v1033_v27  ;;  %v3299_v5 = vsel %vm836_vm2, %v830_v53, %v831_v28  ;;  %v3303_v58 = vsel %vm836_vm2, %v831_v28, %v832_v48 }
 0x1ba   : > { %4105 = vst [vmem:[#allocation77_spill] sm:$0xff] %v3289_v55  ;;  %v3295_v32 = vsel %vm1034_vm3, %v1033_v27, %v4106_v62  ;;  %1471 = vrot.lane.b32.xlu0 %v2754_v9, %s2364_s15  ;;  %v3309_v42 = vsel %vm1232_vm5, %v1230_v14, %v1231_v22  ;;  %v4107_v55 = vrot.slane %v2600_v39, 3  ;;  %v3319_v53 = vsel %vm1034_vm3, %v1030_v20, %v1031_v26 }
 0x1bb   : > { %v3323_v28 = vsel %vm1034_vm3, %v1031_v26, %v1032_v51  ;;  %1477 = vrot.lane.b32.xlu1 %v2790_v35, %s2364_s15  ;;  %v3329_v9 = vsel %vm1232_vm5, %v1228_v61, %v1229_v30  ;;  %v3333_v48 = vsel %vm1232_vm5, %v1229_v30, %v1230_v14  ;;  %v1428_v20 = vrot.slane %v3189_v7, 4 }
 0x1bc   : > { %v3315_v62 = vsel %vm1232_vm5, %v1231_v22, %v4107_v55  ;;  %v3337_v55 = vsel %vm1430_vm6, %v1426_v52, %v1427_v60  ;;  %v1429_v26 = vrot.slane %v3217_v15, 4  ;;  %v4108_v30 = vrot.slane %v2600_v39, 4  ;;  %v4119_v22 = vld [vmem:[#allocation5_spill] sm:$0xff] }
 0x1bd   : > { %v3345_v35 = vsel %vm1430_vm6, %v1427_v60, %v1428_v20 }
 0x1be   : > { %889 = vrot.lane.b32.xlu0 %v2794_v36, %s2361_s9  ;;  %v3349_v61 = vsel %vm1430_vm6, %v1428_v20, %v1429_v26  ;;  %v3355_v52 = vsel %vm1430_vm6, %v1429_v26, %v4108_v30  ;;  %v3459_v26 = vld [vmem:[%s3989_s2 + $0x4] ss:$0 sm:$0xff] }
 0x1bf   : > { %887 = vrot.lane.b32.xlu1 %v2817_v54, %s2361_s9  ;;  %v4115_v54 = vld [vmem:[#allocation30_spill] sm:$0xff] }
 0x1c2   : > { %1087 = vrot.lane.b32.xlu0 %v2799_v41, %s2362_s13  ;;  %v4113_v41 = vld [vmem:[#allocation29_spill] sm:$0xff] }
 0x1c3   : > { %1085 = vrot.lane.b32.xlu1 %v2821_v23, %s2362_s13 }
 0x1c6   : > { %1285 = vrot.lane.b32.xlu0 %v2806_v43, %s2363_s14 }
 0x1c7   : > { %1283 = vrot.lane.b32.xlu1 %v2835_v45, %s2363_s14  ;;  %v4116_v45 = vld [vmem:[#allocation31_spill] sm:$0xff] }
 0x1ca   : > { %1483 = vrot.lane.b32.xlu0 %v2811_v50, %s2364_s15 }
 0x1cb   : > { %1481 = vrot.lane.b32.xlu1 %v2839_v11, %s2364_s15  ;;  %v3426_v11 = vld [vmem:[%s3989_s2 + $0x1] ss:$0 sm:$0xff] }
 0x1ce   : > { %885 = vrot.lane.b32.xlu0 %v2825_v56, %s2361_s9 }
 0x1cf   : > { %891 = vrot.lane.b32.xlu1 %v2873_v10, %s2361_s9  ;;  %v4111_v10 = vld [vmem:[#allocation21_spill] sm:$0xff] }
 0x1d2   : > { %1083 = vrot.lane.b32.xlu0 %v2829_v3, %s2362_s13  ;;  %v4109_v3 = vld [vmem:[#allocation23_spill] sm:$0xff] }
 0x1d3   : > { %1089 = vrot.lane.b32.xlu1 %v2877_v17, %s2362_s13  ;;  %v3431_v17 = vld [vmem:[%s3989_s2 + $0x2] ss:$0 sm:$0xff] }
 0x1d6   : > { %1281 = vrot.lane.b32.xlu0 %v2843_v12, %s2363_s14 }
 0x1d7   : > { %1287 = vrot.lane.b32.xlu1 %v2881_v46, %s2363_s14  ;;  %v4117_v46 = vld [vmem:[#allocation32_spill] sm:$0xff] }
 0x1da   : > { %1479 = vrot.lane.b32.xlu0 %v2847_v16, %s2364_s15 }
 0x1db   : > { %1485 = vrot.lane.b32.xlu1 %v2885_v21, %s2364_s15 }
 0x1de   : > { %897 = vrot.lane.b32.xlu0 %v2889_v63, %s2361_s9 }
 0x1df   : > { %895 = vrot.lane.b32.xlu1 %v2913_v40, %s2361_s9 }
 0x1e2   : > { %1095 = vrot.lane.b32.xlu0 %v2894_v29, %s2362_s13  ;;  %v3438_v29 = vld [vmem:[%s3989_s2] ss:$0 sm:$0xff] }
 0x1e3   : > { %1093 = vrot.lane.b32.xlu1 %v2917_v25, %s2362_s13  ;;  %v772_v20 = vmul.f32 %v4119_v22, %v3438_v29 }
 0x1e6   : > { %1293 = vrot.lane.b32.xlu0 %v2901_v18, %s2363_s14 }
 0x1e7   : > { %1291 = vrot.lane.b32.xlu1 %v2931_v47, %s2363_s14  ;;  %v3447_v47 = vld [vmem:[%s3989_s2 + $0x3] ss:$0 sm:$0xff] }
 0x1ea   : > { %1491 = vrot.lane.b32.xlu0 %v2906_v33, %s2364_s15  ;;  %v4112_v33 = vld [vmem:[#allocation24_spill] sm:$0xff] }
 0x1eb   : > { %1489 = vrot.lane.b32.xlu1 %v4109_v3, %s2364_s15  ;;  %v4120_v3 = vld [vmem:[#allocation33_spill] sm:$0xff] }
 0x1ee   : > { %893 = vrot.lane.b32.xlu0 %v4110_v59, %s2361_s9 }
 0x1ef   : > { %899 = vrot.lane.b32.xlu1 %v2969_v0, %s2361_s9  ;;  %v4114_v0 = vld [vmem:[#allocation25_spill] sm:$0xff] }
 0x1f0   : > { %v874_v40 = vpop.permute.xlu0 %873 }
 0x1f1   : > { %v872_v63 = vpop.permute.xlu1 %871  ;;  %v940_v25 = vmul.f32 %v3426_v11, %v874_v40 }
 0x1f2   : > { %1091 = vrot.lane.b32.xlu0 %v4111_v10, %s2362_s13  ;;  %v939_v18 = vmul.f32 %v3426_v11, %v872_v63  ;;  %v770_v63 = vmul.f32 %v3438_v29, %v2600_v39 }
 0x1f3   : > { %1097 = vrot.lane.b32.xlu1 %v2973_v19, %s2362_s13 }
 0x1f4   : > { %v1072_v21 = vpop.permute.xlu0 %1071 }
 0x1f5   : > { %v1070_v36 = vpop.permute.xlu1 %1069 }
 0x1f6   : > { %1289 = vrot.lane.b32.xlu0 %v4112_v33, %s2363_s14  ;;  %v1137_v51 = vmul.f32 %v3431_v17, %v1070_v36  ;;  %v4121_v33 = vld [vmem:[#allocation6_spill] sm:$0xff] }
 0x1f7   : > { %1295 = vrot.lane.b32.xlu1 %v4113_v41, %s2363_s14  ;;  %v773_v41 = vmul.f32 %v4121_v33, %v3438_v29 }
 0x1f8   : > { %v1270_v43 = vpop.permute.xlu0 %1269 }
 0x1f9   : > { %v1268_v50 = vpop.permute.xlu1 %1267  ;;  %v1336_v36 = vmul.f32 %v3447_v47, %v1270_v43 }
 0x1fa   : > { %1487 = vrot.lane.b32.xlu0 %v4114_v0, %s2364_s15  ;;  %v1335_v40 = vmul.f32 %v3447_v47, %v1268_v50 }
 0x1fb   : > { %1493 = vrot.lane.b32.xlu1 %v4115_v54, %s2364_s15 }
 0x1fc   : > { %v1468_v23 = vpop.permute.xlu0 %1467 }
 0x1fd   : > { %v1466_v56 = vpop.permute.xlu1 %1465 }
 0x1fe   : > { %905 = vrot.lane.b32.xlu0 %v4116_v45, %s2361_s9  ;;  %v1533_v50 = vmul.f32 %v3459_v26, %v1466_v56 }
 0x1ff   : > { %903 = vrot.lane.b32.xlu1 %v3009_v1, %s2361_s9  ;;  %v4118_v1 = vld [vmem:[#allocation7_spill] sm:$0xff] }
 0x200   : > { %v870_v12 = vpop.permute.xlu0 %869  ;;  %v771_v60 = vmul.f32 %v3438_v29, %v4118_v1  ;;  %v4122_v1 = vld [vmem:[#allocation36_spill] sm:$0xff] }
 0x201   : > { %v876_v16 = vpop.permute.xlu1 %875  ;;  %v938_v27 = vmul.f32 %v3426_v11, %v870_v12 }
 0x202   : > { %1103 = vrot.lane.b32.xlu0 %v4117_v46, %s2362_s13  ;;  %v941_v30 = vmul.f32 %v3426_v11, %v876_v16  ;;  %v971_v59 = vadd.f32 %v939_v18, %v771_v60  ;;  %v1534_v18 = vmul.f32 %v3459_v26, %v1468_v23 }
 0x203   : > { %1101 = vrot.lane.b32.xlu1 %v3013_v49, %s2362_s13  ;;  %v1138_v49 = vmul.f32 %v3431_v17, %v1072_v21  ;;  %v972_v21 = vadd.f32 %v940_v25, %v772_v20  ;;  %v970_v12 = vadd.f32 %v938_v27, %v770_v63  ;;  %v4124_v63 = vld [vmem:[#allocation43_spill] sm:$0xff] }
 0x204   : > { %v1068_v19 = vpop.permute.xlu0 %1067  ;;  %v1169_v45 = vadd.f32 %v1137_v51, %v971_v59  ;;  %v3494_v59 = vld [vmem:[%s3990_s3] sm:$0xff] }
 0x205   : > { %v1074_v14 = vpop.permute.xlu1 %1073  ;;  %v1136_v10 = vmul.f32 %v3431_v17, %v1068_v19  ;;  %v1170_v46 = vadd.f32 %v1138_v49, %v972_v21  ;;  %v3486_v49 = vld [vmem:[%s3990_s3 + $0x8] sm:$0xff] }
 0x206   : > { %1301 = vrot.lane.b32.xlu0 %v4120_v3, %s2363_s14  ;;  %v1139_v0 = vmul.f32 %v3431_v17, %v1074_v14  ;;  %v1367_v43 = vadd.f32 %v1335_v40, %v1169_v45  ;;  %v4123_v3 = vld [vmem:[#allocation34_spill] sm:$0xff]  ;;  %v4125_v45 = vld [vmem:[#allocation37_spill] sm:$0xff] }
 0x207   : > { %1299 = vrot.lane.b32.xlu1 %v3023_v6, %s2363_s14  ;;  %v973_v6 = vadd.f32 %v941_v30, %v773_v41  ;;  %v1168_v19 = vadd.f32 %v1136_v10, %v970_v12  ;;  %v1368_v60 = vadd.f32 %v1336_v36, %v1170_v46  ;;  %v4126_v12 = vld [vmem:[#allocation44_spill] sm:$0xff] }
 0x208   : > { %v1266_v54 = vpop.permute.xlu0 %1265  ;;  %v1565_v27 = vadd.f32 %v1533_v50, %v1367_v43 }
 0x209   : > { %v1334_v39 = vmul.f32 %v3447_v47, %v1266_v54  ;;  %v1272_v16 = vpop.permute.xlu1 %1271  ;;  %v1171_v56 = vadd.f32 %v1139_v0, %v973_v6  ;;  %v1566_v23 = vadd.f32 %v1534_v18, %v1368_v60 }
 0x20a   : > { %v1337_v25 = vmul.f32 %v3447_v47, %v1272_v16  ;;  %1499 = vrot.lane.b32.xlu0 %v3002_v37, %s2364_s15  ;;  %v1599_v36 = vadd.f32 %v3486_v49, %v1565_v27 }
 0x20b   : > { %1497 = vrot.lane.b32.xlu1 %v4122_v1, %s2364_s15  ;;  %v1366_v14 = vadd.f32 %v1334_v39, %v1168_v19  ;;  %v1600_v0 = vadd.f32 %v3494_v59, %v1566_v23  ;;  %v4128_v19 = vld [vmem:[#allocation45_spill] sm:$0xff] }
 0x20c   : > { %v1464_v51 = vpop.permute.xlu0 %1463  ;;  %v1369_v37 = vadd.f32 %v1337_v25, %v1171_v56  ;;  %v4127_v25 = vld [vmem:[#allocation39_spill] sm:$0xff] }
 0x20d   : > { %v1532_v22 = vmul.f32 %v3459_v26, %v1464_v51  ;;  %v1470_v20 = vpop.permute.xlu1 %1469 }
 0x20e   : > { %v1535_v30 = vmul.f32 %v3459_v26, %v1470_v20  ;;  %901 = vrot.lane.b32.xlu0 %v4123_v3, %s2361_s9  ;;  %v4130_v20 = vld [vmem:[#allocation46_spill] sm:$0xff] }
 0x20f   : > { %v1564_v40 = vadd.f32 %v1532_v22, %v1366_v14  ;;  %907 = vrot.lane.b32.xlu1 %v4124_v63, %s2361_s9  ;;  %v4129_v14 = vld [vmem:[#allocation40_spill] sm:$0xff] }
 0x210   : > { %v1567_v10 = vadd.f32 %v1535_v30, %v1369_v37  ;;  %v882_v21 = vpop.permute.xlu0 %881 }
 0x211   : > { %v1598_v33 = vadd.f32 %v3494_v59, %v1564_v40  ;;  %v880_v41 = vpop.permute.xlu1 %879  ;;  %v3517_v40 = vld [vmem:[%s3991_s4] ss:$0 sm:$0xff] }
 0x212   : > { %v1601_v54 = vadd.f32 %v3486_v49, %v1567_v10  ;;  %1099 = vrot.lane.b32.xlu0 %v4125_v45, %s2362_s13  ;;  %v4131_v10 = vld [vmem:[#allocation47_spill] sm:$0xff]  ;;  %v944_v45 = vmul.f32 %v3426_v11, %v882_v21 }
 0x213   : > { %v1630_v50 = vmax.f32 %v1598_v33, %v1599_v36  ;;  %1105 = vrot.lane.b32.xlu1 %v4126_v12, %s2362_s13 }
 0x214   : > { %v1637_v39 = vmax.f32 %v1600_v0, %v1601_v54  ;;  %v1080_v16 = vpop.permute.xlu0 %1079 }
 0x215   : > { %v1631_v46 = vrot.slane %v1630_v50, 4  ;;  %v1078_v18 = vpop.permute.xlu1 %1077 }
 0x216   : > { %v1638_v6 = vrot.slane %v1637_v39, 4  ;;  %1297 = vrot.lane.b32.xlu0 %v4127_v25, %s2363_s14  ;;  %v4133_v25 = vld [vmem:[#allocation8_spill] sm:$0xff] }
 0x217   : > { %v1632_v43 = vmax.f32 %v1630_v50, %v1631_v46  ;;  %1303 = vrot.lane.b32.xlu1 %v4128_v19, %s2363_s14  ;;  %v4132_v46 = vld [vmem:[#allocation48_spill] sm:$0xff] }
 0x218   : > { %v1639_v1 = vmax.f32 %v1637_v39, %v1638_v6  ;;  %v1278_v60 = vpop.permute.xlu0 %1277  ;;  %v943_v39 = vmul.f32 %v3426_v11, %v880_v41 }
 0x219   : > { %v1633_v56 = vrot.slane %v1632_v43, 2  ;;  %v1276_v51 = vpop.permute.xlu1 %1275 }
 0x21a   : > { %v1640_v27 = vrot.slane %v1639_v1, 2  ;;  %1495 = vrot.lane.b32.xlu0 %v4129_v14, %s2364_s15  ;;  %v4135_v14 = vld [vmem:[#allocation9_spill] sm:$0xff] }
 0x21b   : > { %v1634_v22 = vmax.f32 %v1632_v43, %v1633_v56  ;;  %1501 = vrot.lane.b32.xlu1 %v4130_v20, %s2364_s15  ;;  %v776_v43 = vmul.f32 %v4133_v25, %v3438_v29  ;;  %v1141_v56 = vmul.f32 %v3431_v17, %v1078_v18 }
 0x21c   : > { %v1641_v23 = vmax.f32 %v1639_v1, %v1640_v27  ;;  %v1476_v37 = vpop.permute.xlu0 %1475  ;;  %v4134_v1 = vld [vmem:[#allocation11_spill] sm:$0xff] }
 0x21d   : > { %v1635_v30 = vrot.slane %v1634_v22, 1  ;;  %v1474_v3 = vpop.permute.xlu1 %1473  ;;  %v775_v21 = vmul.f32 %v3438_v29, %v4134_v1  ;;  %v976_v41 = vadd.f32 %v944_v45, %v776_v43 }
 0x21e   : > { %v1642_v63 = vrot.slane %v1641_v23, 1  ;;  %913 = vrot.lane.b32.xlu0 %v4131_v10, %s2361_s9  ;;  %v1537_v25 = vmul.f32 %v3459_v26, %v1474_v3 }
 0x21f   : > { %v1636_v36 = vmax.f32 %v1634_v22, %v1635_v30  ;;  %911 = vrot.lane.b32.xlu1 %v3095_v24, %s2361_s9  ;;  %v1142_v24 = vmul.f32 %v3431_v17, %v1080_v16  ;;  %v774_v22 = vmul.f32 %v3438_v29, %v4135_v14 }
 0x220   : > { %v1643_v33 = vmax.f32 %v1641_v23, %v1642_v63  ;;  %v878_v0 = vpop.permute.xlu0 %877  ;;  %v4136_v23 = vld [vmem:[#allocation10_spill] sm:$0xff] }
 0x221   : > { %v1749_v54 = vadd.f32 %v3517_v40, %v1636_v36  ;;  %v884_v50 = vpop.permute.xlu1 %883  ;;  %v942_v20 = vmul.f32 %v3426_v11, %v878_v0  ;;  %v777_v30 = vmul.f32 %v4136_v23, %v3438_v29  ;;  %v1174_v18 = vadd.f32 %v1142_v24, %v976_v41 }
 0x222   : > { %v1750_v12 = vadd.f32 %v3517_v40, %v1643_v33  ;;  %1111 = vrot.lane.b32.xlu0 %v4132_v46, %s2362_s13  ;;  %v945_v36 = vmul.f32 %v3426_v11, %v884_v50  ;;  %v4137_v33 = vld [vmem:[#allocation50_spill] sm:$0xff]  ;;  %v1340_v46 = vmul.f32 %v3447_v47, %v1278_v60  ;;  %v1538_v50 = vmul.f32 %v3459_v26, %v1476_v37 }
 0x223   : > { %v1765_v6 = vmax.f32 %v1749_v54, 0.0  ;;  %1109 = vrot.lane.b32.xlu1 %v3099_v2, %s2362_s13  ;;  %v975_v2 = vadd.f32 %v943_v39, %v775_v21  ;;  %v1339_v54 = vmul.f32 %v3447_v47, %v1276_v51  ;;  %v974_v43 = vadd.f32 %v942_v20, %v774_v22 }
 0x224   : > { %v1766_v19 = vmax.f32 %v1750_v12, 0.0  ;;  %v1076_v27 = vpop.permute.xlu0 %1075  ;;  %v977_v21 = vadd.f32 %v945_v36, %v777_v30  ;;  %v1372_v37 = vadd.f32 %v1340_v46, %v1174_v18  ;;  %v4140_v36 = vld [vmem:[#allocation59_spill] sm:$0xff] }
 0x225   : > { %v1082_v16 = vpop.permute.xlu1 %1081  ;;  %v1781_v63 = vpack.c.bf16 %v1765_v6, %v1765_v6  ;;  %v1140_v45 = vmul.f32 %v3431_v17, %v1076_v27  ;;  %v1173_v12 = vadd.f32 %v1141_v56, %v975_v2  ;;  %v4138_v27 = vld [vmem:[#allocation53_spill] sm:$0xff] }
 0x226   : > { %v1782_v10 = vpack.c.bf16 %v1766_v19, %v1766_v19  ;;  %1309 = vrot.lane.b32.xlu0 %v4137_v33, %s2363_s14  ;;  %v1143_v39 = vmul.f32 %v3431_v17, %v1082_v16  ;;  %v1570_v16 = vadd.f32 %v1538_v50, %v1372_v37 }
 0x227   : > { %1307 = vrot.lane.b32.xlu1 %v3111_v38, %s2363_s14  ;;  %v1836_v19 = vunpack.c.l.b16 %v1781_v63  ;;  %v1371_v60 = vadd.f32 %v1339_v54, %v1173_v12  ;;  %v1172_v56 = vadd.f32 %v1140_v45, %v974_v43 }
 0x228   : > { %v1837_v0 = vunpack.c.l.b16 %v1782_v10  ;;  %v1274_v6 = vpop.permute.xlu0 %1273  ;;  %v1175_v41 = vadd.f32 %v1143_v39, %v977_v21  ;;  %v4139_v10 = vld [vmem:[#allocation51_spill] sm:$0xff]  ;;  %v4144_v21 = vld [vmem:[#allocation60_spill] sm:$0xff] }
 0x229   : > { %v1338_v51 = vmul.f32 %v3447_v47, %v1274_v6  ;;  %v1280_v24 = vpop.permute.xlu1 %1279  ;;  %v1569_v22 = vadd.f32 %v1537_v25, %v1371_v60  ;;  %v1604_v6 = vadd.f32 %v3494_v59, %v1570_v16  ;;  %v4142_v25 = vld [vmem:[#allocation15_spill] sm:$0xff]  ;;  %v4146_v16 = vld [vmem:[#allocation61_spill] sm:$0xff] }
 0x22a   : > { %v1852_v1 = vrot.slane %v1837_v0, 7  ;;  %v1341_v38 = vmul.f32 %v3447_v47, %v1280_v24  ;;  %1507 = vrot.lane.b32.xlu0 %v3121_v13, %s2364_s15  ;;  %v4141_v0 = vld [vmem:[#allocation12_spill] sm:$0xff]  ;;  %v779_v43 = vmul.f32 %v3438_v29, %v4142_v25  ;;  %v4143_v24 = vld [vmem:[#allocation54_spill] sm:$0xff] }
 0x22b   : > { %1505 = vrot.lane.b32.xlu1 %v4138_v27, %s2364_s15  ;;  %v1370_v20 = vadd.f32 %v1338_v51, %v1172_v56  ;;  %v1603_v54 = vadd.f32 %v3486_v49, %v1569_v22  ;;  %v780_v12 = vmul.f32 %v4141_v0, %v3438_v29 }
 0x22c   : > { %v1472_v3 = vpop.permute.xlu0 %1471  ;;  %v3560_v14 = vsel %vm1853_vm4, %v1852_v1, %v1836_v19  ;;  %v1373_v63 = vadd.f32 %v1341_v38, %v1175_v41 }
 0x22d   : > { %v1536_v23 = vmul.f32 %v3459_v26, %v1472_v3  ;;  %v1478_v30 = vpop.permute.xlu1 %1477 }
 0x22e   : > { %v1539_v13 = vmul.f32 %v3459_v26, %v1478_v30  ;;  %909 = vrot.lane.b32.xlu0 %v4139_v10, %s2361_s9 }
 0x22f   : > { %v1568_v2 = vadd.f32 %v1536_v23, %v1370_v20  ;;  %915 = vrot.lane.b32.xlu1 %v4140_v36, %s2361_s9  ;;  %v4145_v20 = vld [vmem:[#allocation56_spill] sm:$0xff] }
 0x230   : > { %v1571_v33 = vadd.f32 %v1539_v13, %v1373_v63  ;;  %v890_v18 = vpop.permute.xlu0 %889 }
 0x231   : > { %v1602_v45 = vadd.f32 %v3494_v59, %v1568_v2  ;;  %v948_v46 = vmul.f32 %v3426_v11, %v890_v18  ;;  %v888_v39 = vpop.permute.xlu1 %887 }
 0x232   : > { %v1605_v50 = vadd.f32 %v3486_v49, %v1571_v33  ;;  %v947_v51 = vmul.f32 %v3426_v11, %v888_v39  ;;  %1107 = vrot.lane.b32.xlu0 %v4143_v24, %s2362_s13 }
 0x233   : > { %v1644_v19 = vmax.f32 %v1602_v45, %v1603_v54  ;;  %v980_v1 = vadd.f32 %v948_v46, %v780_v12  ;;  %1113 = vrot.lane.b32.xlu1 %v4144_v21, %s2362_s13  ;;  %v4147_v45 = vld [vmem:[#allocation58_spill] sm:$0xff] }
 0x234   : > { %v1651_v38 = vmax.f32 %v1604_v6, %v1605_v50  ;;  %v979_v60 = vadd.f32 %v947_v51, %v779_v43  ;;  %v1088_v56 = vpop.permute.xlu0 %1087  ;;  %v4148_v46 = vld [vmem:[#allocation62_spill] sm:$0xff] }
 0x235   : > { %v1645_v27 = vrot.slane %v1644_v19, 4  ;;  %v1146_v37 = vmul.f32 %v3431_v17, %v1088_v56  ;;  %v1086_v41 = vpop.permute.xlu1 %1085 }
 0x236   : > { %v1652_v3 = vrot.slane %v1651_v38, 4  ;;  %v1145_v22 = vmul.f32 %v3431_v17, %v1086_v41  ;;  %1305 = vrot.lane.b32.xlu0 %v4145_v20, %s2363_s14 }
 0x237   : > { %v1646_v23 = vmax.f32 %v1644_v19, %v1645_v27  ;;  %v1178_v30 = vadd.f32 %v1146_v37, %v980_v1  ;;  %1311 = vrot.lane.b32.xlu1 %v4146_v16, %s2363_s14  ;;  %v4149_v1 = vld [vmem:[#allocation63_spill] sm:$0xff]  ;;  %v4152_v16 = vld [vmem:[#allocation14_spill] sm:$0xff] }
 0x238   : > { %v1653_v63 = vmax.f32 %v1651_v38, %v1652_v3  ;;  %v1177_v13 = vadd.f32 %v1145_v22, %v979_v60  ;;  %v1286_v10 = vpop.permute.xlu0 %1285  ;;  %v4150_v60 = vld [vmem:[#allocation64_spill] sm:$0xff]  ;;  %v4151_v3 = vld [vmem:[#allocation13_spill] sm:$0xff] }
 0x239   : > { %v1647_v2 = vrot.slane %v1646_v23, 2  ;;  %v1344_v36 = vmul.f32 %v3447_v47, %v1286_v10  ;;  %v1284_v33 = vpop.permute.xlu1 %1283  ;;  %v778_v22 = vmul.f32 %v3438_v29, %v4151_v3  ;;  %v4153_v10 = vld [vmem:[#allocation65_spill] sm:$0xff] }
 0x23a   : > { %v1654_v18 = vrot.slane %v1653_v63, 2  ;;  %v1343_v54 = vmul.f32 %v3447_v47, %v1284_v33  ;;  %1503 = vrot.lane.b32.xlu0 %v4147_v45, %s2364_s15 }
 0x23b   : > { %v1648_v0 = vmax.f32 %v1646_v23, %v1647_v2  ;;  %v1376_v12 = vadd.f32 %v1344_v36, %v1178_v30  ;;  %1509 = vrot.lane.b32.xlu1 %v4148_v46, %s2364_s15 }
 0x23c   : > { %v1655_v39 = vmax.f32 %v1653_v63, %v1654_v18  ;;  %v1375_v6 = vadd.f32 %v1343_v54, %v1177_v13  ;;  %v1484_v50 = vpop.permute.xlu0 %1483  ;;  %v781_v63 = vmul.f32 %v4152_v16, %v3438_v29 }
 0x23d   : > { %v1649_v25 = vrot.slane %v1648_v0, 1  ;;  %v1542_v43 = vmul.f32 %v3459_v26, %v1484_v50  ;;  %v1482_v51 = vpop.permute.xlu1 %1481 }
 0x23e   : > { %v1656_v24 = vrot.slane %v1655_v39, 1  ;;  %v1541_v19 = vmul.f32 %v3459_v26, %v1482_v51  ;;  %921 = vrot.lane.b32.xlu0 %v4149_v1, %s2361_s9 }
 0x23f   : > { %v1650_v21 = vmax.f32 %v1648_v0, %v1649_v25  ;;  %v1574_v38 = vadd.f32 %v1542_v43, %v1376_v12  ;;  %919 = vrot.lane.b32.xlu1 %v4150_v60, %s2361_s9  ;;  %v4154_v60 = vld [vmem:[#allocation68_spill] sm:$0xff] }
 0x240   : > { %v1657_v56 = vmax.f32 %v1655_v39, %v1656_v24  ;;  %v1573_v27 = vadd.f32 %v1541_v19, %v1375_v6  ;;  %v886_v37 = vpop.permute.xlu0 %885 }
 0x241   : > { %v1751_v41 = vadd.f32 %v3517_v40, %v1650_v21  ;;  %v946_v20 = vmul.f32 %v3426_v11, %v886_v37  ;;  %v892_v23 = vpop.permute.xlu1 %891 }
 0x242   : > { %v1752_v30 = vadd.f32 %v3517_v40, %v1657_v56  ;;  %v949_v13 = vmul.f32 %v3426_v11, %v892_v23  ;;  %1119 = vrot.lane.b32.xlu0 %v4153_v10, %s2362_s13  ;;  %v4155_v56 = vld [vmem:[#allocation69_spill] sm:$0xff] }
 0x243   : > { %v1767_v2 = vmax.f32 %v1751_v41, 0.0  ;;  %v978_v36 = vadd.f32 %v946_v20, %v778_v22  ;;  %1117 = vrot.lane.b32.xlu1 %v3197_v31, %s2362_s13 }
 0x244   : > { %v1768_v33 = vmax.f32 %v1752_v30, 0.0  ;;  %v981_v18 = vadd.f32 %v949_v13, %v781_v63  ;;  %v1084_v54 = vpop.permute.xlu0 %1083  ;;  %v4156_v30 = vld [vmem:[#allocation67_spill] sm:$0xff] }
 0x245   : > { %v1783_v45 = vpack.c.bf16 %v1767_v2, %v1767_v2  ;;  %v1144_v0 = vmul.f32 %v3431_v17, %v1084_v54  ;;  %v1090_v12 = vpop.permute.xlu1 %1089  ;;  %v4157_v2 = vld [vmem:[#allocation16_spill] sm:$0xff]  ;;  %v1608_v54 = vadd.f32 %v3494_v59, %v1574_v38 }
 0x246   : > { %v1784_v46 = vpack.c.bf16 %v1768_v33, %v1768_v33  ;;  %v1147_v39 = vmul.f32 %v3431_v17, %v1090_v12  ;;  %1317 = vrot.lane.b32.xlu0 %v3205_v4, %s2363_s14 }
 0x247   : > { %v1838_v6 = vunpack.c.l.b16 %v1783_v45  ;;  %v1176_v50 = vadd.f32 %v1144_v0, %v978_v36  ;;  %1315 = vrot.lane.b32.xlu1 %v3209_v44, %s2363_s14  ;;  %v784_v36 = vmul.f32 %v4157_v2, %v3438_v29  ;;  %v4158_v0 = vld [vmem:[#allocation19_spill] sm:$0xff] }
 0x248   : > { %v1839_v25 = vunpack.c.l.b16 %v1784_v46  ;;  %v1179_v31 = vadd.f32 %v1147_v39, %v981_v18  ;;  %v1282_v43 = vpop.permute.xlu0 %1281  ;;  %v783_v12 = vmul.f32 %v3438_v29, %v4158_v0  ;;  %v4159_v46 = vld [vmem:[#allocation71_spill] sm:$0xff]  ;;  %v4164_v0 = vld [vmem:[#allocation76_spill] sm:$0xff] }
 0x249   : > { %v1855_v51 = vrot.slane %v1838_v6, 6  ;;  %v1342_v24 = vmul.f32 %v3447_v47, %v1282_v43  ;;  %v1288_v19 = vpop.permute.xlu1 %1287  ;;  %v4160_v6 = vld [vmem:[#allocation73_spill] sm:$0xff] }
 0x24a   : > { %v1858_v1 = vrot.slane %v1839_v25, 5  ;;  %v1345_v21 = vmul.f32 %v3447_v47, %v1288_v19  ;;  %1515 = vrot.lane.b32.xlu0 %v4154_v60, %s2364_s15 }
 0x24b   : > { %v1374_v4 = vadd.f32 %v1342_v24, %v1176_v50  ;;  %1513 = vrot.lane.b32.xlu1 %v4155_v56, %s2364_s15  ;;  %v1857_v44 = vsel %vm1856_vm7, %v1855_v51, %v3560_v14  ;;  %v1607_v14 = vadd.f32 %v3486_v49, %v1573_v27 }
 0x24c   : > { %v1377_v37 = vadd.f32 %v1345_v21, %v1179_v31  ;;  %v1480_v41 = vpop.permute.xlu0 %1479  ;;  %v3627_v3 = vsel %vm1859_vm8, %v1858_v1, %v1857_v44  ;;  %v4161_v1 = vld [vmem:[#allocation72_spill] sm:$0xff] }
 0x24d   : > { %v1540_v22 = vmul.f32 %v3459_v26, %v1480_v41  ;;  %v1486_v20 = vpop.permute.xlu1 %1485 }
 0x24e   : > { %v1543_v23 = vmul.f32 %v3459_v26, %v1486_v20  ;;  %917 = vrot.lane.b32.xlu0 %v4156_v30, %s2361_s9 }
 0x24f   : > { %v1572_v16 = vadd.f32 %v1540_v22, %v1374_v4  ;;  %923 = vrot.lane.b32.xlu1 %v3246_v34, %s2361_s9  ;;  %v4162_v4 = vld [vmem:[#allocation74_spill] sm:$0xff] }
 0x250   : > { %v1575_v63 = vadd.f32 %v1543_v23, %v1377_v37  ;;  %v898_v13 = vpop.permute.xlu0 %897 }
 0x251   : > { %v1606_v10 = vadd.f32 %v3494_v59, %v1572_v16  ;;  %v952_v33 = vmul.f32 %v3426_v11, %v898_v13  ;;  %v896_v18 = vpop.permute.xlu1 %895  ;;  %v4163_v16 = vld [vmem:[#allocation75_spill] sm:$0xff] }
 0x252   : > { %v1609_v45 = vadd.f32 %v3486_v49, %v1575_v63  ;;  %v951_v34 = vmul.f32 %v3426_v11, %v896_v18  ;;  %1115 = vrot.lane.b32.xlu0 %v4159_v46, %s2362_s13 }
 0x253   : > { %v1658_v27 = vmax.f32 %v1606_v10, %v1607_v14  ;;  %v984_v39 = vadd.f32 %v952_v33, %v784_v36  ;;  %1121 = vrot.lane.b32.xlu1 %v4160_v6, %s2362_s13  ;;  %v4165_v6 = vld [vmem:[#allocation17_spill] sm:$0xff] }
 0x254   : > { %v1665_v50 = vmax.f32 %v1608_v54, %v1609_v45  ;;  %v983_v25 = vadd.f32 %v951_v34, %v783_v12  ;;  %v1096_v31 = vpop.permute.xlu0 %1095 }
 0x255   : > { %v1659_v43 = vrot.slane %v1658_v27, 4  ;;  %v1150_v38 = vmul.f32 %v3431_v17, %v1096_v31  ;;  %v1094_v51 = vpop.permute.xlu1 %1093 }
 0x256   : > { %v1666_v24 = vrot.slane %v1665_v50, 4  ;;  %v1149_v19 = vmul.f32 %v3431_v17, %v1094_v51  ;;  %1313 = vrot.lane.b32.xlu0 %v4161_v1, %s2363_s14 }
 0x257   : > { %v1660_v21 = vmax.f32 %v1658_v27, %v1659_v43  ;;  %v1182_v60 = vadd.f32 %v1150_v38, %v984_v39  ;;  %1319 = vrot.lane.b32.xlu1 %v4162_v4, %s2363_s14  ;;  %v4166_v38 = vld [vmem:[#allocation18_spill] sm:$0xff] }
 0x258   : > { %v1667_v56 = vmax.f32 %v1665_v50, %v1666_v24  ;;  %v1181_v44 = vadd.f32 %v1149_v19, %v983_v25  ;;  %v1294_v37 = vpop.permute.xlu0 %1293  ;;  %v782_v50 = vmul.f32 %v3438_v29, %v4165_v6  ;;  %v785_v51 = vmul.f32 %v4166_v38, %v3438_v29 }
 0x259   : > { %v1661_v41 = vrot.slane %v1660_v21, 2  ;;  %v1348_v22 = vmul.f32 %v3447_v47, %v1294_v37  ;;  %v1292_v20 = vpop.permute.xlu1 %1291 }
 0x25a   : > { %v1668_v23 = vrot.slane %v1667_v56, 2  ;;  %v1347_v30 = vmul.f32 %v3447_v47, %v1292_v20  ;;  %1511 = vrot.lane.b32.xlu0 %v4163_v16, %s2364_s15 }
 0x25b   : > { %v1662_v63 = vmax.f32 %v1660_v21, %v1661_v41  ;;  %v1380_v13 = vadd.f32 %v1348_v22, %v1182_v60  ;;  %1517 = vrot.lane.b32.xlu1 %v3274_v8, %s2364_s15 }
 0x25c   : > { %v1669_v14 = vmax.f32 %v1667_v56, %v1668_v23  ;;  %v1379_v10 = vadd.f32 %v1347_v30, %v1181_v44  ;;  %v1492_v2 = vpop.permute.xlu0 %1491 }
 0x25d   : > { %v1663_v36 = vrot.slane %v1662_v63, 1  ;;  %v1546_v33 = vmul.f32 %v3459_v26, %v1492_v2  ;;  %v1490_v18 = vpop.permute.xlu1 %1489 }
 0x25e   : > { %v1670_v54 = vrot.slane %v1669_v14, 1  ;;  %v1545_v45 = vmul.f32 %v3459_v26, %v1490_v18  ;;  %929 = vrot.lane.b32.xlu0 %v4164_v0, %s2361_s9 }
 0x25f   : > { %v1664_v12 = vmax.f32 %v1662_v63, %v1663_v36  ;;  %v1578_v34 = vadd.f32 %v1546_v33, %v1380_v13  ;;  %931 = vrot.lane.b32.xlu1 %v3284_v57, %s2361_s9  ;;  %v4167_v57 = vld [vmem:[#allocation77_spill] sm:$0xff] }
 0x260   : > { %v1671_v46 = vmax.f32 %v1669_v14, %v1670_v54  ;;  %v1577_v8 = vadd.f32 %v1545_v45, %v1379_v10  ;;  %v894_v27 = vpop.permute.xlu0 %893 }
 0x261   : > { %v1753_v39 = vadd.f32 %v3517_v40, %v1664_v12  ;;  %v950_v25 = vmul.f32 %v3426_v11, %v894_v27  ;;  %v900_v31 = vpop.permute.xlu1 %899  ;;  %v4168_v27 = vld [vmem:[#allocation22_spill] sm:$0xff] }
 0x262   : > { %v1754_v43 = vadd.f32 %v3517_v40, %v1671_v46  ;;  %v953_v24 = vmul.f32 %v3426_v11, %v900_v31  ;;  %1127 = vrot.lane.b32.xlu0 %v4167_v57, %s2362_s13  ;;  %v4169_v31 = vld [vmem:[#allocation28_spill] sm:$0xff] }
 0x263   : > { %v1769_v19 = vmax.f32 %v1753_v39, 0.0  ;;  %v982_v1 = vadd.f32 %v950_v25, %v782_v50  ;;  %1129 = vrot.lane.b32.xlu1 %v3295_v32, %s2362_s13  ;;  %v788_v39 = vmul.f32 %v4168_v27, %v3438_v29  ;;  %v1612_v25 = vadd.f32 %v3494_v59, %v1578_v34 }
 0x264   : > { %v1770_v21 = vmax.f32 %v1754_v43, 0.0  ;;  %v985_v60 = vadd.f32 %v953_v24, %v785_v51  ;;  %v1092_v4 = vpop.permute.xlu0 %1091  ;;  %v787_v43 = vmul.f32 %v3438_v29, %v4169_v31 }
 0x265   : > { %v1785_v56 = vpack.c.bf16 %v1769_v19, %v1769_v19  ;;  %v1148_v44 = vmul.f32 %v3431_v17, %v1092_v4  ;;  %v1098_v37 = vpop.permute.xlu1 %1097 }
 0x266   : > { %v1151_v41 = vmul.f32 %v3431_v17, %v1098_v37  ;;  %1325 = vrot.lane.b32.xlu0 %v3309_v42, %s2363_s14  ;;  %v1786_v22 = vpack.c.bf16 %v1770_v21, %v1770_v21 }
 0x267   : > { %v1840_v20 = vunpack.c.l.b16 %v1785_v56  ;;  %v1180_v23 = vadd.f32 %v1148_v44, %v982_v1  ;;  %1327 = vrot.lane.b32.xlu1 %v3315_v62, %s2363_s14 }
 0x268   : > { %v1183_v30 = vadd.f32 %v1151_v41, %v985_v60  ;;  %v1290_v32 = vpop.permute.xlu0 %1289  ;;  %v1841_v16 = vunpack.c.l.b16 %v1786_v22 }
 0x269   : > { %v1346_v63 = vmul.f32 %v3447_v47, %v1290_v32  ;;  %v1296_v13 = vpop.permute.xlu1 %1295  ;;  %v1861_v14 = vrot.slane %v1840_v20, 4 }
 0x26a   : > { %v1349_v10 = vmul.f32 %v3447_v47, %v1296_v13  ;;  %925 = vrot.lane.b32.xlu0 %v3299_v5, %s2361_s9  ;;  %v1864_v42 = vrot.slane %v1841_v16, 3 }
 0x26b   : > { %v1378_v2 = vadd.f32 %v1346_v63, %v1180_v23  ;;  %927 = vrot.lane.b32.xlu1 %v3303_v58, %s2361_s9  ;;  %v1863_v62 = vsel %vm1862_vm9, %v1861_v14, %v3627_v3  ;;  %v1611_v3 = vadd.f32 %v3486_v49, %v1577_v8  ;;  %s3946_s9 = scalar_lea.sflag [#allocation3], %s270_s22 }
 0x26c   : > { %v1381_v36 = vadd.f32 %v1349_v10, %v1183_v30  ;;  %v1488_v33 = vpop.permute.xlu0 %1487  ;;  %v3694_v18 = vsel %vm1865_vm10, %v1864_v42, %v1863_v62 }
 0x26d   : > { %v1544_v54 = vmul.f32 %v3459_v26, %v1488_v33  ;;  %v1494_v45 = vpop.permute.xlu1 %1493 }
 0x26e   : > { %v1547_v0 = vmul.f32 %v3459_v26, %v1494_v45  ;;  %1123 = vrot.lane.b32.xlu0 %v3319_v53, %s2362_s13 }
 0x26f   : > { %v1576_v5 = vadd.f32 %v1544_v54, %v1378_v2  ;;  %1125 = vrot.lane.b32.xlu1 %v3323_v28, %s2362_s13  ;;  %v4170_v54 = vld [vmem:[#allocation26_spill] sm:$0xff]  ;;  %s2366_s13 = smov [#allocation2]  }
 0x270   : > { %v1579_v58 = vadd.f32 %v1547_v0, %v1381_v36  ;;  %v906_v12 = vpop.permute.xlu0 %905  ;;  %v786_v45 = vmul.f32 %v3438_v29, %v4170_v54 }
 0x271   : > { %v1610_v46 = vadd.f32 %v3494_v59, %v1576_v5  ;;  %v956_v6 = vmul.f32 %v3426_v11, %v906_v12  ;;  %v904_v50 = vpop.permute.xlu1 %903 }
 0x272   : > { %v1613_v53 = vadd.f32 %v3486_v49, %v1579_v58  ;;  %v955_v28 = vmul.f32 %v3426_v11, %v904_v50  ;;  %1321 = vrot.lane.b32.xlu0 %v3329_v9, %s2363_s14  ;;  %v4171_v58 = vmov 0.0  }
 0x273   : > { %v1672_v8 = vmax.f32 %v1610_v46, %v1611_v3  ;;  %v988_v38 = vadd.f32 %v956_v6, %v788_v39  ;;  %1323 = vrot.lane.b32.xlu1 %v3333_v48, %s2363_s14  ;;  %2221 = vmatprep.mubr.msk.bf16.mxu1 %vm2365_vm11, %v4171_v58  ;;  %v4172_v3 = vld [vmem:[#allocation27_spill] sm:$0xff]  ;;  %v2280_v39 = vld [vmem:[%s3992_s5 + $0x8] sm:$0xff]   ;;  %s2299_s14 = sshll.u32 %s2366_s13, 4  ;;  %s2300_s14 = int_to_ptr.vmem [resolvable:$false] %s2299_s14 }
 0x274   : > { %v1679_v51 = vmax.f32 %v1612_v25, %v1613_v53  ;;  %v987_v24 = vadd.f32 %v955_v28, %v787_v43  ;;  %v1104_v57 = vpop.permute.xlu0 %1103  ;;  %v789_v46 = vmul.f32 %v4172_v3, %v3438_v29  ;;  %p2302_p0 = scmp.lt.s32.totalorder %s3939_s17, %s2300_s14 }
 0x275   : > { %v1673_v19 = vrot.slane %v1672_v8, 4  ;;  %v1154_v34 = vmul.f32 %v3431_v17, %v1104_v57  ;;  %v1102_v1 = vpop.permute.xlu1 %1101 }
 0x276   : > { %v1680_v21 = vrot.slane %v1679_v51, 4  ;;  %v1153_v60 = vmul.f32 %v3431_v17, %v1102_v1  ;;  %1519 = vrot.lane.b32.xlu0 %v3337_v55, %s2364_s15 }
 0x277   : > { %v1674_v4 = vmax.f32 %v1672_v8, %v1673_v19  ;;  %v1186_v9 = vadd.f32 %v1154_v34, %v988_v38  ;;  %1521 = vrot.lane.b32.xlu1 %v3345_v35, %s2364_s15 }
 0x278   : > { %v1681_v56 = vmax.f32 %v1679_v51, %v1680_v21  ;;  %v1185_v48 = vadd.f32 %v1153_v60, %v987_v24  ;;  %v1302_v44 = vpop.permute.xlu0 %1301  ;;  %v2281_v24 = vld [vmem:[%s3992_s5 + $0x10] sm:$0xff]  }
 0x279   : > { %v1675_v37 = vrot.slane %v1674_v4, 2  ;;  %v1352_v41 = vmul.f32 %v3447_v47, %v1302_v44  ;;  %v1300_v22 = vpop.permute.xlu1 %1299  ;;  %v2282_v44 = vld [vmem:[%s3992_s5 + $0x18] sm:$0xff]  }
 0x27a   : > { %v1682_v20 = vrot.slane %v1681_v56, 2  ;;  %v1351_v23 = vmul.f32 %v3447_v47, %v1300_v22  ;;  %1523 = vrot.lane.b32.xlu0 %v3349_v61, %s2364_s15 }
 0x27b   : > { %v1676_v30 = vmax.f32 %v1674_v4, %v1675_v37  ;;  %v1384_v55 = vadd.f32 %v1352_v41, %v1186_v9  ;;  %1525 = vrot.lane.b32.xlu1 %v3355_v52, %s2364_s15  ;;  %v2279_v52 = vld [vmem:[%s3992_s5] sm:$0xff]   ;;  %s2301_s15 = scalar_lea.vmem %s2300_s14, 512 }
 0x27c   : > { %v1683_v32 = vmax.f32 %v1681_v56, %v1682_v20  ;;  %v1383_v35 = vadd.f32 %v1351_v23, %v1185_v48  ;;  %v1500_v16 = vpop.permute.xlu0 %1499  ;;  %2206 = vmatpush3.bf16.msra.mxu1 %v2279_v52  ;;  %p2303_p1 = scmp.lt.s32.totalorder %s2301_s15, %s2295_s28 }
 0x27d   : > { %v1677_v63 = vrot.slane %v1676_v30, 1  ;;  %v1550_v13 = vmul.f32 %v3459_v26, %v1500_v16  ;;  %v1498_v14 = vpop.permute.xlu1 %1497  ;;  %2207 = vmatprep.subr.bf16.mxu1 %v4171_v58  ;;  %v2283_v16 = vld [vmem:[%s3992_s5 + $0x20] sm:$0xff]  }
 0x27e   : > { %v1684_v10 = vrot.slane %v1683_v32, 1  ;;  %v1549_v42 = vmul.f32 %v3459_v26, %v1498_v14  ;;  %p2304_p2 = por %p2303_p1, %p2302_p0 }
 0x27f   : > { %v1678_v2 = vmax.f32 %v1676_v30, %v1677_v63  ;;  %v3730_v62 = vadd.f32 %v1550_v13, %v1384_v55 }
 0x280   : > { %v1685_v36 = vmax.f32 %v1683_v32, %v1684_v10  ;;  %v1581_v61 = vadd.f32 %v1549_v42, %v1383_v35  ;;  %v902_v33 = vpop.permute.xlu0 %901  ;;  %2208 = vmatpush3.bf16.msra.mxu1 %v2280_v39  ;;  %v4173_v42 = vld [vmem:[#allocation35_spill] sm:$0xff]  ;;  %p2305_p3 = pnand %p2304_p2, %p2298_p13 }
 0x281   : > { %v954_v0 = vmul.f32 %v3426_v11, %v902_v33  ;;  %v908_v5 = vpop.permute.xlu1 %907  ;;  %v1755_v12 = vadd.f32 %v3517_v40, %v1678_v2  ;;  %2209 = vmatprep.subr.bf16.mxu1 %v4171_v58  ;;  %v792_v2 = vmul.f32 %v4173_v42, %v3438_v29  ;;  %v1616_v52 = vadd.f32 %v3494_v59, %v3730_v62 }
 0x282   : > { %v957_v27 = vmul.f32 %v3426_v11, %v908_v5  ;;  %v1756_v6 = vadd.f32 %v3517_v40, %v1685_v36  ;;  %v1615_v14 = vadd.f32 %v3486_v49, %v1581_v61  ;;  %v2284_v61 = vld [vmem:[%s3992_s5 + $0x28] sm:$0xff]  }
 0x283   : > { %v986_v50 = vadd.f32 %v954_v0, %v786_v45  ;;  %v1771_v25 = vmax.f32 %v1755_v12, 0.0  ;;  %v4174_v45 = vld [vmem:[#allocation42_spill] sm:$0xff] }
 0x284   : > { %v989_v53 = vadd.f32 %v957_v27, %v789_v46  ;;  %v1100_v31 = vpop.permute.xlu0 %1099  ;;  %v1772_v43 = vmax.f32 %v1756_v6, 0.0  ;;  %2210 = vmatpush3.bf16.msra.mxu1 %v2281_v24  ;;  %v791_v0 = vmul.f32 %v3438_v29, %v4174_v45 }
 0x285   : > { %v1152_v28 = vmul.f32 %v3431_v17, %v1100_v31  ;;  %v1106_v8 = vpop.permute.xlu1 %1105  ;;  %v1787_v38 = vpack.c.bf16 %v1771_v25, %v1771_v25  ;;  %2211 = vmatprep.subr.bf16.mxu1 %v4171_v58 }
 0x286   : > { %v1155_v51 = vmul.f32 %v3431_v17, %v1106_v8  ;;  %v1788_v57 = vpack.c.bf16 %v1772_v43, %v1772_v43 }
 0x287   : > { %v1184_v19 = vadd.f32 %v1152_v28, %v986_v50  ;;  %v1842_v34 = vunpack.c.l.b16 %v1787_v38 }
 0x288   : > { %v1187_v1 = vadd.f32 %v1155_v51, %v989_v53  ;;  %v1298_v21 = vpop.permute.xlu0 %1297  ;;  %v1843_v60 = vunpack.c.l.b16 %v1788_v57  ;;  %2212 = vmatpush3.bf16.msra.mxu1 %v2282_v44 }
 0x289   : > { %v1350_v4 = vmul.f32 %v3447_v47, %v1298_v21  ;;  %v1304_v9 = vpop.permute.xlu1 %1303  ;;  %v1867_v56 = vrot.slane %v1842_v34, 2  ;;  %2213 = vmatprep.subr.bf16.mxu1 %v4171_v58 }
 0x28a   : > { %v1353_v48 = vmul.f32 %v3447_v47, %v1304_v9  ;;  %v1870_v37 = vrot.slane %v1843_v60, 1 }
 0x28b   : > { %v1382_v41 = vadd.f32 %v1350_v4, %v1184_v19  ;;  %v1869_v22 = vsel %vm1868_vm12, %v1867_v56, %v3694_v18 }
 0x28c   : > { %v1385_v20 = vadd.f32 %v1353_v48, %v1187_v1  ;;  %v1496_v23 = vpop.permute.xlu0 %1495  ;;  %v3763_v30 = vsel %vm1871_vm13, %v1870_v37, %v1869_v22  ;;  %2214 = vmatpush3.bf16.msra.mxu1 %v2283_v16 }
 0x28d   : > { %v1548_v55 = vmul.f32 %v3459_v26, %v1496_v23  ;;  %v1502_v32 = vpop.permute.xlu1 %1501  ;;  %2215 = vmatprep.subr.bf16.mxu1 %v4171_v58 }
 0x28e   : > { %v1551_v35 = vmul.f32 %v3459_v26, %v1502_v32  ;;  %v4175_v32 = vld [vmem:[#allocation38_spill] sm:$0xff] }
 0x28f   : > { %v1580_v63 = vadd.f32 %v1548_v55, %v1382_v41 }
 0x290   : > { %v1583_v13 = vadd.f32 %v1551_v35, %v1385_v20  ;;  %v914_v18 = vpop.permute.xlu0 %913  ;;  %2216 = vmatpush3.bf16.msra.mxu1 %v2284_v61 }
 0x291   : > { %v1614_v10 = vadd.f32 %v3494_v59, %v1580_v63  ;;  %v960_v36 = vmul.f32 %v3426_v11, %v914_v18  ;;  %v912_v33 = vpop.permute.xlu1 %911  ;;  %2217 = vmatprep.subr.bf16.mxu1 %v4171_v58  ;;  %v4176_v18 = vld [vmem:[#allocation41_spill] sm:$0xff] }
 0x292   : > { %v1617_v54 = vadd.f32 %v3486_v49, %v1583_v13  ;;  %v959_v5 = vmul.f32 %v3426_v11, %v912_v33  ;;  %v2285_v11 = vld [vmem:[%s3992_s5 + $0x30] sm:$0xff]  }
 0x293   : > { %v1686_v12 = vmax.f32 %v1614_v10, %v1615_v14  ;;  %v992_v3 = vadd.f32 %v960_v36, %v792_v2 }
 0x294   : > { %v1693_v46 = vmax.f32 %v1616_v52, %v1617_v54  ;;  %v991_v27 = vadd.f32 %v959_v5, %v791_v0  ;;  %v1112_v39 = vpop.permute.xlu0 %1111  ;;  %2218 = vmatpush3.bf16.msra.mxu1 %v2285_v11  ;;  %v3821_v5 = vld [vmem:[%s3989_s2 + $0x2] ss:$0 sm:$0xff] }
 0x295   : > { %v1687_v62 = vrot.slane %v1686_v12, 4  ;;  %v1158_v6 = vmul.f32 %v3431_v17, %v1112_v39  ;;  %v1110_v50 = vpop.permute.xlu1 %1109  ;;  %2219 = vmatprep.subr.bf16.mxu1 %v4171_v58  ;;  %v3804_v58 = vld [vmem:[%s3989_s2] ss:$0 sm:$0xff]  ;;  %v3828_v39 = vld [vmem:[%s3989_s2 + $0x3] ss:$0 sm:$0xff] }
 0x296   : > { %v1694_v25 = vrot.slane %v1693_v46, 4  ;;  %v1157_v29 = vmul.f32 %v3431_v17, %v1110_v50  ;;  %v2286_v17 = vld [vmem:[%s3992_s5 + $0x38] sm:$0xff]   ;;  %v790_v35 = vmul.f32 %v3804_v58, %v4175_v32  ;;  %v793_v14 = vmul.f32 %v3804_v58, %v4176_v18 }
 0x297   : > { %v1688_v53 = vmax.f32 %v1686_v12, %v1687_v62  ;;  %v1190_v31 = vadd.f32 %v1158_v6, %v992_v3 }
 0x298   : > { %v1695_v43 = vmax.f32 %v1693_v46, %v1694_v25  ;;  %v1189_v28 = vadd.f32 %v1157_v29, %v991_v27  ;;  %v1310_v8 = vpop.permute.xlu0 %1309  ;;  %2220 = vmatpush3.bf16.msra.mxu1 %v2286_v17 }
 0x299   : > { %v1689_v38 = vrot.slane %v1688_v53, 2  ;;  %v1356_v51 = vmul.f32 %v3447_v47, %v1310_v8  ;;  %v1308_v24 = vpop.permute.xlu1 %1307 }
 0x29a   : > { %v1696_v57 = vrot.slane %v1695_v43, 2  ;;  %v1355_v19 = vmul.f32 %v3447_v47, %v1308_v24 }
 0x29b   : > { %v1690_v34 = vmax.f32 %v1688_v53, %v1689_v38  ;;  %v1388_v1 = vadd.f32 %v1356_v51, %v1190_v31 }
 0x29c   : > { %v1697_v21 = vmax.f32 %v1695_v43, %v1696_v57  ;;  %v1387_v60 = vadd.f32 %v1355_v19, %v1189_v28  ;;  %v1508_v4 = vpop.permute.xlu0 %1507  ;;  %v3838_v28 = vld [vmem:[%s3989_s2 + $0x4] ss:$0 sm:$0xff] }
 0x29d   : > { %v1691_v9 = vrot.slane %v1690_v34, 1  ;;  %v1554_v56 = vmul.f32 %v3459_v26, %v1508_v4  ;;  %v1506_v48 = vpop.permute.xlu1 %1505 }
 0x29e   : > { %v1698_v44 = vrot.slane %v1697_v21, 1  ;;  %v1553_v37 = vmul.f32 %v3459_v26, %v1506_v48  ;;  %v3811_v26 = vld [vmem:[%s3989_s2 + $0x1] ss:$0 sm:$0xff] }
 0x29f   : > { %v1692_v47 = vmax.f32 %v1690_v34, %v1691_v9  ;;  %v1586_v41 = vadd.f32 %v1554_v56, %v1388_v1 }
 0x2a0   : > { %v1699_v22 = vmax.f32 %v1697_v21, %v1698_v44  ;;  %v1585_v20 = vadd.f32 %v1553_v37, %v1387_v60  ;;  %v910_v23 = vpop.permute.xlu0 %909 }
 0x2a1   : > { %v1757_v55 = vadd.f32 %v3517_v40, %v1692_v47  ;;  %v958_v16 = vmul.f32 %v3811_v26, %v910_v23  ;;  %v916_v63 = vpop.permute.xlu1 %915  ;;  %v1620_v60 = vadd.f32 %v3494_v59, %v1586_v41 }
 0x2a2   : > { %v1758_v13 = vadd.f32 %v3517_v40, %v1699_v22  ;;  %v961_v10 = vmul.f32 %v3811_v26, %v916_v63  ;;  %v1619_v34 = vadd.f32 %v3486_v49, %v1585_v20 }
 0x2a3   : > { %v1773_v42 = vmax.f32 %v1757_v55, 0.0  ;;  %v990_v2 = vadd.f32 %v958_v16, %v790_v35 }
 0x2a4   : > { %v1774_v36 = vmax.f32 %v1758_v13, 0.0  ;;  %v993_v33 = vadd.f32 %v961_v10, %v793_v14  ;;  %v1108_v52 = vpop.permute.xlu0 %1107 }
 0x2a5   : > { %v1114_v54 = vpop.permute.xlu1 %1113  ;;  %v1789_v45 = vpack.c.bf16 %v1773_v42, %v1773_v42  ;;  %v1156_v12 = vmul.f32 %v3821_v5, %v1108_v52 }
 0x2a6   : > { %v1790_v0 = vpack.c.bf16 %v1774_v36, %v1774_v36  ;;  %v1159_v61 = vmul.f32 %v3821_v5, %v1114_v54 }
 0x2a7   : > { %v1844_v50 = vunpack.c.l.b16 %v1789_v45  ;;  %v1188_v11 = vadd.f32 %v1156_v12, %v990_v2  ;;  %v4177_v45 = vld [vmem:[#allocation49_spill] sm:$0xff] }
 0x2a8   : > { %v1845_v3 = vunpack.c.l.b16 %v1790_v0  ;;  %v1191_v46 = vadd.f32 %v1159_v61, %v993_v33  ;;  %v1306_v27 = vpop.permute.xlu0 %1305  ;;  %v796_v0 = vmul.f32 %v3804_v58, %v4177_v45  ;;  %v3886_v45 = vld [vmem:[%s3990_s3] sm:$0xff] }
 0x2a9   : > { %v1354_v62 = vmul.f32 %v3828_v39, %v1306_v27  ;;  %v1312_v6 = vpop.permute.xlu1 %1311 }
 0x2aa   : > { %v1873_v25 = vrot.slane %v1845_v3, 7  ;;  %v1357_v29 = vmul.f32 %v3828_v39, %v1312_v6  ;;  %v4178_v3 = vld [vmem:[#allocation57_spill] sm:$0xff] }
 0x2ab   : > { %v1386_v43 = vadd.f32 %v1354_v62, %v1188_v11 }
 0x2ac   : > { %v1504_v53 = vpop.permute.xlu0 %1503  ;;  %v3833_v31 = vsel %vm1853_vm4, %v1873_v25, %v1844_v50  ;;  %v1389_v51 = vadd.f32 %v1357_v29, %v1191_v46  ;;  %v795_v46 = vmul.f32 %v3804_v58, %v4178_v3  ;;  %v4179_v25 = vld [vmem:[#allocation52_spill] sm:$0xff] }
 0x2ad   : > { %v1552_v8 = vmul.f32 %v3838_v28, %v1504_v53  ;;  %v1510_v38 = vpop.permute.xlu1 %1509 }
 0x2ae   : > { %v1555_v24 = vmul.f32 %v3838_v28, %v1510_v38 }
 0x2af   : > { %v1584_v57 = vadd.f32 %v1552_v8, %v1386_v43  ;;  %v4180_v8 = vld [vmem:[#allocation55_spill] sm:$0xff] }
 0x2b0   : > { %v1587_v19 = vadd.f32 %v1555_v24, %v1389_v51  ;;  %v922_v17 = vpop.permute.xlu0 %921  ;;  %v797_v38 = vmul.f32 %v3804_v58, %v4180_v8 }
 0x2b1   : > { %v1618_v1 = vadd.f32 %v3494_v59, %v1584_v57  ;;  %v920_v21 = vpop.permute.xlu1 %919  ;;  %v964_v2 = vmul.f32 %v3811_v26, %v922_v17 }
 0x2b2   : > { %v1621_v4 = vadd.f32 %v3486_v49, %v1587_v19  ;;  %v963_v52 = vmul.f32 %v3811_v26, %v920_v21 }
 0x2b3   : > { %v1700_v9 = vmax.f32 %v1618_v1, %v1619_v34  ;;  %v996_v50 = vadd.f32 %v964_v2, %v796_v0 }
 0x2b4   : > { %v1707_v56 = vmax.f32 %v1620_v60, %v1621_v4  ;;  %v1120_v48 = vpop.permute.xlu0 %1119  ;;  %v995_v43 = vadd.f32 %v963_v52, %v795_v46 }
 0x2b5   : > { %v1701_v44 = vrot.slane %v1700_v9, 4  ;;  %v1118_v37 = vpop.permute.xlu1 %1117  ;;  %v1162_v61 = vmul.f32 %v3821_v5, %v1120_v48 }
 0x2b6   : > { %v1708_v47 = vrot.slane %v1707_v56, 4  ;;  %v1161_v27 = vmul.f32 %v3821_v5, %v1118_v37 }
 0x2b7   : > { %v1702_v22 = vmax.f32 %v1700_v9, %v1701_v44  ;;  %v1194_v57 = vadd.f32 %v1162_v61, %v996_v50 }
 0x2b8   : > { %v1709_v23 = vmax.f32 %v1707_v56, %v1708_v47  ;;  %v1318_v55 = vpop.permute.xlu0 %1317  ;;  %v1193_v1 = vadd.f32 %v1161_v27, %v995_v43 }
 0x2b9   : > { %v1703_v32 = vrot.slane %v1702_v22, 2  ;;  %v1316_v35 = vpop.permute.xlu1 %1315  ;;  %v1360_v21 = vmul.f32 %v3828_v39, %v1318_v55 }
 0x2ba   : > { %v1710_v16 = vrot.slane %v1709_v23, 2  ;;  %v1359_v19 = vmul.f32 %v3828_v39, %v1316_v35 }
 0x2bb   : > { %v1704_v20 = vmax.f32 %v1702_v22, %v1703_v32 }
 0x2bc   : > { %v1711_v63 = vmax.f32 %v1709_v23, %v1710_v16  ;;  %v1516_v13 = vpop.permute.xlu0 %1515  ;;  %v1391_v35 = vadd.f32 %v1359_v19, %v1193_v1 }
 0x2bd   : > { %v1705_v18 = vrot.slane %v1704_v20, 1  ;;  %v1514_v14 = vpop.permute.xlu1 %1513  ;;  %v1558_v22 = vmul.f32 %v3838_v28, %v1516_v13 }
 0x2be   : > { %v1712_v59 = vrot.slane %v1711_v63, 1  ;;  %v1557_v56 = vmul.f32 %v3838_v28, %v1514_v14 }
 0x2bf   : > { %v1706_v41 = vmax.f32 %v1704_v20, %v1705_v18  ;;  %v1392_v20 = vadd.f32 %v1360_v21, %v1194_v57 }
 0x2c0   : > { %v1713_v49 = vmax.f32 %v1711_v63, %v1712_v59  ;;  %v918_v10 = vpop.permute.xlu0 %917  ;;  %v1589_v59 = vadd.f32 %v1557_v56, %v1391_v35 }
 0x2c1   : > { %v1759_v42 = vadd.f32 %v3517_v40, %v1706_v41  ;;  %v924_v36 = vpop.permute.xlu1 %923  ;;  %v962_v29 = vmul.f32 %v3811_v26, %v918_v10  ;;  %v1590_v13 = vadd.f32 %v1558_v22, %v1392_v20  ;;  %v4181_v22 = vld [vmem:[#allocation66_spill] sm:$0xff] }
 0x2c2   : > { %v1760_v33 = vadd.f32 %v3517_v40, %v1713_v49  ;;  %v794_v40 = vmul.f32 %v3804_v58, %v4179_v25  ;;  %v965_v51 = vmul.f32 %v3811_v26, %v924_v36 }
 0x2c3   : > { %v1775_v54 = vmax.f32 %v1759_v42, 0.0 }
 0x2c4   : > { %v1776_v12 = vmax.f32 %v1760_v33, 0.0  ;;  %v1116_v62 = vpop.permute.xlu0 %1115  ;;  %v994_v48 = vadd.f32 %v962_v29, %v794_v40  ;;  %v997_v23 = vadd.f32 %v965_v51, %v797_v38 }
 0x2c5   : > { %v1791_v6 = vpack.c.bf16 %v1775_v54, %v1775_v54  ;;  %v1122_v11 = vpop.permute.xlu1 %1121  ;;  %v1160_v17 = vmul.f32 %v3821_v5, %v1116_v62 }
 0x2c6   : > { %v1792_v53 = vpack.c.bf16 %v1776_v12, %v1776_v12  ;;  %v1163_v60 = vmul.f32 %v3821_v5, %v1122_v11  ;;  %v1624_v12 = vadd.f32 %v3886_v45, %v1590_v13 }
 0x2c7   : > { %v1846_v24 = vunpack.c.l.b16 %v1791_v6  ;;  %v1192_v16 = vadd.f32 %v1160_v17, %v994_v48 }
 0x2c8   : > { %v1847_v34 = vunpack.c.l.b16 %v1792_v53  ;;  %v1314_v4 = vpop.permute.xlu0 %1313  ;;  %v1195_v63 = vadd.f32 %v1163_v60, %v997_v23  ;;  %v3894_v60 = vld [vmem:[%s3991_s4] ss:$0 sm:$0xff]  ;;  %v798_v23 = vmul.f32 %v3804_v58, %v4181_v22 }
 0x2c9   : > { %v1875_v9 = vrot.slane %v1846_v24, 6  ;;  %v1358_v44 = vmul.f32 %v3828_v39, %v1314_v4  ;;  %v1320_v37 = vpop.permute.xlu1 %1319 }
 0x2ca   : > { %v1877_v47 = vrot.slane %v1847_v34, 5  ;;  %v1361_v32 = vmul.f32 %v3828_v39, %v1320_v37 }
 0x2cb   : > { %v1876_v55 = vsel %vm1856_vm7, %v1875_v9, %v3833_v31  ;;  %v1390_v41 = vadd.f32 %v1358_v44, %v1192_v16  ;;  %v3880_v31 = vld [vmem:[%s3990_s3 + $0x8] sm:$0xff] }
 0x2cc   : > { %v1512_v18 = vpop.permute.xlu0 %1511  ;;  %v3873_v14 = vsel %vm1859_vm8, %v1877_v47, %v1876_v55  ;;  %v1393_v42 = vadd.f32 %v1361_v32, %v1195_v63  ;;  %v1623_v54 = vadd.f32 %v3880_v31, %v1589_v59  ;;  %v4182_v55 = vld [vmem:[#allocation70_spill] sm:$0xff] }
 0x2cd   : > { %v1556_v49 = vmul.f32 %v3838_v28, %v1512_v18  ;;  %v1518_v10 = vpop.permute.xlu1 %1517  ;;  %v799_v20 = vmul.f32 %v3804_v58, %v4182_v55 }
 0x2ce   : > { %v1559_v2 = vmul.f32 %v3838_v28, %v1518_v10 }
 0x2cf   : > { %v1588_v36 = vadd.f32 %v1556_v49, %v1390_v41  ;;  %v800_v41 = vmul.f32 %v3804_v58, %v3189_v7 }
 0x2d0   : > { %v1591_v33 = vadd.f32 %v1559_v2, %v1393_v42  ;;  %v930_v52 = vpop.permute.xlu0 %929  ;;  %v801_v42 = vmul.f32 %v3804_v58, %v3217_v15 }
 0x2d1   : > { %v1622_v0 = vadd.f32 %v3886_v45, %v1588_v36  ;;  %v932_v61 = vpop.permute.xlu1 %931  ;;  %v968_v47 = vmul.f32 %v3811_v26, %v930_v52 }
 0x2d2   : > { %v1625_v3 = vadd.f32 %v3880_v31, %v1591_v33  ;;  %v969_v16 = vmul.f32 %v3811_v26, %v932_v61 }
 0x2d3   : > { %v1714_v46 = vmax.f32 %v1622_v0, %v1623_v54  ;;  %v1000_v52 = vadd.f32 %v968_v47, %v800_v41 }
 0x2d4   : > { %v1721_v27 = vmax.f32 %v1624_v12, %v1625_v3  ;;  %v1128_v62 = vpop.permute.xlu0 %1127  ;;  %v1001_v61 = vadd.f32 %v969_v16, %v801_v42 }
 0x2d5   : > { %v1715_v6 = vrot.slane %v1714_v46, 4  ;;  %v1130_v50 = vpop.permute.xlu1 %1129  ;;  %v1166_v54 = vmul.f32 %v3821_v5, %v1128_v62 }
 0x2d6   : > { %v1722_v25 = vrot.slane %v1721_v27, 4  ;;  %v1167_v12 = vmul.f32 %v3821_v5, %v1130_v50 }
 0x2d7   : > { %v1716_v40 = vmax.f32 %v1714_v46, %v1715_v6 }
 0x2d8   : > { %v1723_v29 = vmax.f32 %v1721_v27, %v1722_v25  ;;  %v1326_v11 = vpop.permute.xlu0 %1325  ;;  %v1199_v50 = vadd.f32 %v1167_v12, %v1001_v61 }
 0x2d9   : > { %v1717_v53 = vrot.slane %v1716_v40, 2  ;;  %v1328_v43 = vpop.permute.xlu1 %1327  ;;  %v1364_v27 = vmul.f32 %v3828_v39, %v1326_v11 }
 0x2da   : > { %v1724_v8 = vrot.slane %v1723_v29, 2 }
 0x2db   : > { %v1718_v38 = vmax.f32 %v1716_v40, %v1717_v53  ;;  %v1365_v40 = vmul.f32 %v3828_v39, %v1328_v43 }
 0x2dc   : > { %v1725_v51 = vmax.f32 %v1723_v29, %v1724_v8  ;;  %v926_v24 = vpop.permute.xlu0 %925  ;;  %v1198_v8 = vadd.f32 %v1166_v54, %v1000_v52 }
 0x2dd   : > { %v1719_v57 = vrot.slane %v1718_v38, 1  ;;  %v928_v19 = vpop.permute.xlu1 %927  ;;  %v966_v9 = vmul.f32 %v3811_v26, %v926_v24  ;;  %v1397_v43 = vadd.f32 %v1365_v40, %v1199_v50 }
 0x2de   : > { %v1726_v17 = vrot.slane %v1725_v51, 1  ;;  %v967_v44 = vmul.f32 %v3811_v26, %v928_v19 }
 0x2df   : > { %v1720_v34 = vmax.f32 %v1718_v38, %v1719_v57  ;;  %v998_v49 = vadd.f32 %v966_v9, %v798_v23  ;;  %v1396_v57 = vadd.f32 %v1364_v27, %v1198_v8 }
 0x2e0   : > { %v1727_v1 = vmax.f32 %v1725_v51, %v1726_v17  ;;  %v1124_v21 = vpop.permute.xlu0 %1123  ;;  %v999_v2 = vadd.f32 %v967_v44, %v799_v20 }
 0x2e1   : > { %v1761_v4 = vadd.f32 %v3894_v60, %v1720_v34  ;;  %v1126_v56 = vpop.permute.xlu1 %1125  ;;  %v1164_v32 = vmul.f32 %v3821_v5, %v1124_v21 }
 0x2e2   : > { %v1762_v48 = vadd.f32 %v3894_v60, %v1727_v1  ;;  %v1165_v63 = vmul.f32 %v3821_v5, %v1126_v56 }
 0x2e3   : > { %v1777_v37 = vmax.f32 %v1761_v4, 0.0  ;;  %v1196_v0 = vadd.f32 %v1164_v32, %v998_v49 }
 0x2e4   : > { %v1778_v35 = vmax.f32 %v1762_v48, 0.0  ;;  %v1322_v18 = vpop.permute.xlu0 %1321  ;;  %v1197_v7 = vadd.f32 %v1165_v63, %v999_v2 }
 0x2e5   : > { %v1793_v59 = vpack.c.bf16 %v1777_v37, %v1777_v37  ;;  %v1362_v10 = vmul.f32 %v3828_v39, %v1322_v18  ;;  %v1324_v13 = vpop.permute.xlu1 %1323 }
 0x2e6   : > { %v1363_v26 = vmul.f32 %v3828_v39, %v1324_v13  ;;  %v1794_v36 = vpack.c.bf16 %v1778_v35, %v1778_v35 }
 0x2e7   : > { %v1848_v33 = vunpack.c.l.b16 %v1793_v59  ;;  %v1394_v6 = vadd.f32 %v1362_v10, %v1196_v0 }
 0x2e8   : > { %v1520_v3 = vpop.permute.xlu0 %1519  ;;  %v1849_v46 = vunpack.c.l.b16 %v1794_v36  ;;  %v1395_v29 = vadd.f32 %v1363_v26, %v1197_v7 }
 0x2e9   : > { %v1560_v15 = vmul.f32 %v3838_v28, %v1520_v3  ;;  %v1522_v58 = vpop.permute.xlu1 %1521  ;;  %v1879_v25 = vrot.slane %v1848_v33, 4 }
 0x2ea   : > { %v1561_v53 = vmul.f32 %v3838_v28, %v1522_v58  ;;  %v1881_v62 = vrot.slane %v1849_v46, 3 }
 0x2eb   : > { %v1592_v38 = vadd.f32 %v1560_v15, %v1394_v6  ;;  %v1880_v5 = vsel %vm1862_vm9, %v1879_v25, %v3873_v14 }
 0x2ec   : > { %v1593_v51 = vadd.f32 %v1561_v53, %v1395_v29  ;;  %v1524_v24 = vpop.permute.xlu0 %1523  ;;  %v1882_v11 = vsel %vm1865_vm10, %v1881_v62, %v1880_v5 }
 0x2ed   : > { %v1626_v19 = vadd.f32 %v3886_v45, %v1592_v38  ;;  %v1562_v17 = vmul.f32 %v3838_v28, %v1524_v24  ;;  %v1526_v39 = vpop.permute.xlu1 %1525 }
 0x2ee   : > { %v1627_v34 = vadd.f32 %v3880_v31, %v1593_v51  ;;  %v1563_v1 = vmul.f32 %v3838_v28, %v1526_v39 }
 0x2ef   : > { %v1594_v21 = vadd.f32 %v1562_v17, %v1396_v57 }
 0x2f0   : > { %v1728_v4 = vmax.f32 %v1626_v19, %v1627_v34  ;;  %v1595_v9 = vadd.f32 %v1563_v1, %v1397_v43 }
 0x2f1   : > { %v1628_v14 = vadd.f32 %v3886_v45, %v1594_v21 }
 0x2f2   : > { %v1729_v56 = vrot.slane %v1728_v4, 4  ;;  %v1629_v48 = vadd.f32 %v3880_v31, %v1595_v9 }
 0x2f4   : > { %v1730_v44 = vmax.f32 %v1728_v4, %v1729_v56  ;;  %v1735_v37 = vmax.f32 %v1628_v14, %v1629_v48 }
 0x2f6   : > { %v1731_v47 = vrot.slane %v1730_v44, 2  ;;  %v1736_v22 = vrot.slane %v1735_v37, 4 }
 0x2f8   : > { %v1732_v23 = vmax.f32 %v1730_v44, %v1731_v47  ;;  %v1737_v32 = vmax.f32 %v1735_v37, %v1736_v22 }
 0x2fa   : > { %v1733_v35 = vrot.slane %v1732_v23, 1  ;;  %v1738_v16 = vrot.slane %v1737_v32, 2 }
 0x2fc   : > { %v1734_v55 = vmax.f32 %v1732_v23, %v1733_v35  ;;  %v1739_v20 = vmax.f32 %v1737_v32, %v1738_v16 }
 0x2fe   : > { %v1740_v63 = vrot.slane %v1739_v20, 1  ;;  %v1763_v28 = vadd.f32 %v3894_v60, %v1734_v55 }
 0x300   : > { %v1741_v18 = vmax.f32 %v1739_v20, %v1740_v63  ;;  %v1779_v59 = vmax.f32 %v1763_v28, 0.0 }
 0x302   : > { %v1764_v45 = vadd.f32 %v3894_v60, %v1741_v18  ;;  %v1795_v41 = vpack.c.bf16 %v1779_v59, %v1779_v59  ;;  %v2121_v60 = vld [vmem:[%s3993_s6] ss:$0 sm:$0xff] }
 0x304   : > { %v1780_v31 = vmax.f32 %v1764_v45, 0.0  ;;  %v1850_v49 = vunpack.c.l.b16 %v1795_v41 }
 0x306   : > { %v1796_v10 = vpack.c.bf16 %v1780_v31, %v1780_v31  ;;  %v1883_v13 = vrot.slane %v1850_v49, 2 }
 0x308   : > { %v1851_v42 = vunpack.c.l.b16 %v1796_v10  ;;  %v1884_v2 = vsel %vm1868_vm12, %v1883_v13, %v1882_v11 }
 0x30a   : > { %v1885_v26 = vrot.slane %v1851_v42, 1 }
 0x30c   : > { %v1886_v36 = vsel %vm1871_vm13, %v1885_v26, %v1884_v2 }
 0x30d   : > { %v1887_v33 = vpack.c.b16 %v1886_v36, %v3763_v30 }
 0x30f   : > { %2222 = vmatmul.mubr.bf16.vlgmr.msra.gmra.mrb[0].mxu1 %v1887_v33 }
 0x3e2   : > { %v1971_v52 = vpop.f32.mrb[0].mxu1 }
 0x3e3   : > { %v1972_v54 = vadd.f32 %v2121_v60, %v1971_v52  ;;  %v2223_v0 = vpop.f32.mrb[1].mxu1 }
 0x3e4   : > { %v1974_v30 = vpop.f32.mrb[2].mxu1 }
 0x3e5   : > { %1978 = vst [vmem:[%s272_s16] sm:$0xff] %v1972_v54  ;;  %v1975_v61 = vadd.f32 %v2121_v60, %v1974_v30  ;;  %v2224_v12 = vpop.f32.mrb[3].mxu1 }
 0x3e7   : > { %1979 = vst [vmem:[%s272_s16 + $0x8] sm:$0xff] %v1975_v61 }
 0x3e8   : > { %2308 = shalt.err (!%p2305_p3)
}
 0x3e9   : > { %s2309_s22 = scalar_lea.hbm %s3944_s21, 256  ;;  %s2313_s8 = scalar_lea.hbm %s3994_s7, 512 }
 0x3ea   : > { %p2310_p4 = scmp.ne.s32.totalorder %s3944_s21, %s2309_s22  ;;  %p2314_p9 = scmp.lt.u32.totalorder %s3944_s21, %s3994_s7 }
 0x3eb   : > { %p2315_p10 = scmp.lt.u32.totalorder %s2313_s8, %s2309_s22  ;;  %p2317_p12 = scmp.lt.u32.totalorder %s2309_s22, %s3944_s21 }
 0x3ec   : > { %p2311_p7 = pnand %p2310_p4, %p2447_p5 }
 0x3ed   : > { %p2316_p11 = por %p2315_p10, %p2314_p9 }
 0x3ee   : > { %p2312_p8 = pneg %p2311_p7 }
 0x3ef   : > { %p2318_p13 = por %p2317_p12, %p2316_p11 }
 0x3f1   : > { %p2319_p0 = pnand %p2318_p13, %p2312_p8 }
 0x3f3   : > { %2322 = shalt.err (!%p2319_p0)
}
 0x3f4   : > { %s2367_s19 = smov 128   ;;  %s2368_s20 = smov 8  }
 0x3f5   : > { %2225 = dma.vmem_to_hbm [thread:$0]  (%p2447_p5), %s3939_s17, 256, %s3944_s21, %s3946_s9, %s2367_s19, %s2367_s19, %s2368_s20  }
 0x3f6 PF: > { %p2231_p1 = scmp.ge.s32.totalorder %s2357_s27, 2  ;;  %s2009_s28 = sand.u32 1, %s2345_s24  }
 0x3f7   : > { %s2010_s13 = scalar_lea.sflag [#allocation3], %s2009_s28 }
 0x3f8   : > { %p2228_p2 = pnand %p2231_p1, %p2451_p6 }
 0x3fa   : > { %2340 = dma.done.wait (!%p2228_p2), %s2010_s13, 256  }
 0x3fb   : > { %2342 = vsyncadd (!%p2228_p2), %s2010_s13, 4294967040  ;;  %p17_p3 = scmp.ge.s32.totalorder %s2434_s30, 4   ;;  %s4183_s24 = smov %s2349_s25 }
 0x3fc   : > { %s4184_s25 = smov %s2353_s26  ;;  %s4185_s26 = smov %s2445_s10 }
 0x3fd   : > { %s4186_s27 = smov %s2434_s30  ;;  %19 = sbr.rel (!%p17_p3) target bundleno = 3 (0x3), region = 83 }
 0x404   :  { %2015 = vsyncpa [#allocation3], 1 }
 0x405   :  { %2017 = vsyncpa [#allocation3 + $0x1], 1 }

</bundles_post_ra>
